<compile_context>
chip_gen: v7x
topology: tpu7x:2x2x1
jax: 0.10.0
libtpu: 0.0.40
codegen_flags: <defaults>
</compile_context>

<pallas_src>
import math
from functools import partial

import jax
import jax.numpy as jnp
import numpy as np
from jax import lax
from jax.experimental import pallas as pl
from jax.experimental.pallas import tpu as pltpu

D_MODEL = 32
NHEAD = 4
HEAD_DIM = D_MODEL // NHEAD
LN_EPS = 1e-5
LAYER_SCALE_INIT = 0.1

# Row indices into the packed (N_VEC, D) "vecs" parameter slab.
LN_SA_G, LN_SA_B = 0, 1
LN_MHA_G, LN_MHA_B = 2, 3
LN_ENC_G, LN_ENC_B = 4, 5
LN_FF_G, LN_FF_B = 6, 7
LS_SA, LS_MHA, LS_FF = 8, 9, 10
B_OUT_SA, B_OUT_CA = 11, 12
FF_B1, FF_B2 = 13, 14
N_VEC = 15

SA_IDX, CA_IDX = 0, 1


# ------------------------------------------------------------ matmul helper
def _bdot(a, b, a_dim, b_dim):
    """Leading-batch-dim matmul: contract dim `a_dim` of a with `b_dim` of b."""
    return lax.dot_general(a, b, (((a_dim,), (b_dim,)), ((0,), (0,))),
                           preferred_element_type=jnp.float32)


# -------------------------------------------------------------- Pallas kernel
def _make_kernel(bb, T, S):
    """bb = batch elements handled per grid step (static)."""
    D, H, HD = D_MODEL, NHEAD, HEAD_DIM
    G = bb * H  # joint (batch, head) batch dim for the attention matmuls

    def kernel(x_ref, src_ref, w_in_ref, b_in_ref, w_out_ref, ff_w_ref,
               vecs_ref, out_ref):
        xf = x_ref[...].reshape(bb * T, D)       # (bb*T, D)
        srcf = src_ref[...].reshape(bb * S, D)   # (bb*S, D)
        vecs = vecs_ref[...]                     # (N_VEC, D)

        def row(i):
            return vecs[i:i + 1, :]              # (1, D)

        def layer_norm(h, gi, bi):
            # Single-pass LN: var = E[h^2] - mu^2 (one fewer lane-reduce pass).
            mu = jnp.mean(h, axis=-1, keepdims=True)
            msq = jnp.mean(h * h, axis=-1, keepdims=True)
            inv = lax.rsqrt(msq - mu * mu + LN_EPS)
            return (h - mu) * inv * row(gi) + row(bi)

        def in_proj(h, n, w, b):
            # h: (bb*n, D) tokens; w: (bb, F, D); b: (F, 1)  ->  (bb, F, n).
            # Feature-major output so q/k/v and per-head splits below are free
            # sublane-aligned slices / reshapes (no transposes, no lane slices).
            return _bdot(w, h.reshape(bb, n, D), 2, 2) + b

        def softmax(s):
            s = s - jnp.max(s, axis=-1, keepdims=True)
            p = jnp.exp(s)
            return p * pl.reciprocal(jnp.sum(p, axis=-1, keepdims=True),
                                     approx=True)

        def attention(idx, q_ln, kv_ln, nq, nkv, fused_qkv):
            w_in = w_in_ref[idx]      # (bb, 3D, D); q rows pre-scaled 1/sqrt(HD)
            b_in = b_in_ref[idx]      # (3D, 1);     q part pre-scaled
            w_out_t = w_out_ref[idx]  # (bb, D, D) = out_proj.weight.T

            if fused_qkv:
                # Self-attention: single fused in-projection for q, k and v.
                qkv_t = in_proj(q_ln, nq, w_in, b_in)              # (bb, 3D, nq)
                q_t = qkv_t[:, 0:D, :]
                k_t = qkv_t[:, D:2 * D, :]
                v_t = qkv_t[:, 2 * D:3 * D, :]
            else:
                q_t = in_proj(q_ln, nq, w_in[:, 0:D, :], b_in[0:D, :])
                kv_t = in_proj(kv_ln, nkv, w_in[:, D:3 * D, :], b_in[D:3 * D, :])
                k_t = kv_t[:, 0:D, :]
                v_t = kv_t[:, D:2 * D, :]

            # Free (sublane) regroupings: (bb, D, n) -> (bb*H, HD, n).
            q_g = q_t.reshape(G, HD, nq)
            k_g = k_t.reshape(G, HD, nkv)
            v_g = v_t.reshape(G, HD, nkv)

            # Scores: contract HD in the native orientation, batched over
            # (batch, head) in one dot_general.  Softmax scale already folded.
            s = _bdot(q_g, k_g, 1, 1)                              # (G, nq, nkv)
            p = softmax(s)

            # Context, transposed: (G, HD, nkv) x (G, nq, nkv) -> (G, HD, nq).
            ctx_t = _bdot(v_g, p, 2, 2)
            ctx_b = ctx_t.reshape(bb, D, nq)                       # free merge

            # Single out-projection matmul per batch element (no per-head sum):
            # (bb, D, nq) x (bb, D, D) contracting D -> (bb, nq, D).
            o = _bdot(ctx_b, w_out_t, 1, 1)
            return o.reshape(bb * nq, D)

        # --- x = x + ls_sa * SelfAttention(LN_sa(x)) ---
        # TODO(synk): attention masks / pos_embeddings are the None path;
        #             Dropout & DropPath are identity (eval semantics).
        h = layer_norm(xf, LN_SA_G, LN_SA_B)
        sa = attention(SA_IDX, h, h, T, T, True) + row(B_OUT_SA)
        xf = xf + row(LS_SA) * sa

        # --- x = x + ls_mha * CrossAttention(LN_mha(x), LN_enc(source)) ---
        hq = layer_norm(xf, LN_MHA_G, LN_MHA_B)
        hk = layer_norm(srcf, LN_ENC_G, LN_ENC_B)
        ca = attention(CA_IDX, hq, hk, T, S, False) + row(B_OUT_CA)
        xf = xf + row(LS_MHA) * ca

        # --- x = x + ls_ff * MLP(LN_ff(x)) ---
        # TODO(synk): MLP class definition not provided; assumed 2-layer MLP
        #             with hidden=d_model and ReLU.
        h = layer_norm(xf, LN_FF_G, LN_FF_B)
        h1 = jnp.maximum(
            jnp.dot(h, ff_w_ref[0], preferred_element_type=jnp.float32)
            + row(FF_B1), 0.0)
        ff = (jnp.dot(h1, ff_w_ref[1], preferred_element_type=jnp.float32)
              + row(FF_B2))
        xf = xf + row(LS_FF) * ff

        out_ref[...] = xf.reshape(bb, T, D)

    return kernel


# ------------------------------------------------------ host-side param packing
def init_params(key):
    """PyTorch-layout parameters (same convention as nn.MultiheadAttention)."""
    D = D_MODEL
    ks = jax.random.split(key, 8)

    def w(k, shape, scale=0.02):
        return scale * jax.random.normal(k, shape, dtype=jnp.float32)

    return {
        "ln_sa_g": jnp.ones((1, D), jnp.float32), "ln_sa_b": jnp.zeros((1, D), jnp.float32),
        "sa_w_in": w(ks[0], (3 * D, D)), "sa_b_in": jnp.zeros((1, 3 * D), jnp.float32),
        "sa_w_out": w(ks[1], (D, D)), "sa_b_out": jnp.zeros((1, D), jnp.float32),
        "ls_sa": LAYER_SCALE_INIT * jnp.ones((1, D), jnp.float32),
        "ln_mha_g": jnp.ones((1, D), jnp.float32), "ln_mha_b": jnp.zeros((1, D), jnp.float32),
        "ln_enc_g": jnp.ones((1, D), jnp.float32), "ln_enc_b": jnp.zeros((1, D), jnp.float32),
        "mha_w_in": w(ks[2], (3 * D, D)), "mha_b_in": jnp.zeros((1, 3 * D), jnp.float32),
        "mha_w_out": w(ks[3], (D, D)), "mha_b_out": jnp.zeros((1, D), jnp.float32),
        "ls_mha": LAYER_SCALE_INIT * jnp.ones((1, D), jnp.float32),
        "ln_ff_g": jnp.ones((1, D), jnp.float32), "ln_ff_b": jnp.zeros((1, D), jnp.float32),
        "ff_w1": w(ks[4], (D, D)), "ff_b1": w(ks[5], (1, D)),
        "ff_w2": w(ks[6], (D, D)), "ff_b2": w(ks[7], (1, D)),
        "ls_ff": LAYER_SCALE_INIT * jnp.ones((1, D), jnp.float32),
    }


def _kernel_params(p, bb):
    """Repack PyTorch-layout params into a few MXU/DMA-friendly slabs."""
    D = D_MODEL
    scale = 1.0 / math.sqrt(HEAD_DIM)

    def pack_in(w_in, b_in):
        # Fold 1/sqrt(head_dim) into the q rows; bias as a (3D, 1) column so it
        # lane-broadcasts over the (feature-major) projection output.
        w = w_in.astype(jnp.float32)
        b = jnp.reshape(b_in, (3 * D, 1)).astype(jnp.float32)
        w = jnp.concatenate([w[:D] * scale, w[D:]], axis=0)
        b = jnp.concatenate([b[:D] * scale, b[D:]], axis=0)
        return w, b

    sa_w, sa_b = pack_in(p["sa_w_in"], p["sa_b_in"])
    ca_w, ca_b = pack_in(p["mha_w_in"], p["mha_b_in"])

    # Batch-broadcast host-side so the in-kernel dots batch over bb directly.
    w_in_all = jnp.broadcast_to(jnp.stack([sa_w, ca_w])[:, None],
                                (2, bb, 3 * D, D))               # (2, bb, 3D, D)
    b_in_all = jnp.stack([sa_b, ca_b])                           # (2, 3D, 1)
    w_out_all = jnp.broadcast_to(
        jnp.stack([jnp.transpose(p["sa_w_out"]),
                   jnp.transpose(p["mha_w_out"])])[:, None],
        (2, bb, D, D))                                           # (2, bb, D, D)
    ff_w = jnp.stack([jnp.transpose(p["ff_w1"]),
                      jnp.transpose(p["ff_w2"])])                # (2, D, D)
    vecs = jnp.concatenate([
        p["ln_sa_g"], p["ln_sa_b"],
        p["ln_mha_g"], p["ln_mha_b"],
        p["ln_enc_g"], p["ln_enc_b"],
        p["ln_ff_g"], p["ln_ff_b"],
        p["ls_sa"], p["ls_mha"], p["ls_ff"],
        p["sa_b_out"], p["mha_b_out"],
        p["ff_b1"], p["ff_b2"],
    ], axis=0)                                                   # (N_VEC, D)
    return w_in_all, b_in_all, w_out_all, ff_w, vecs


# --------------------------------------------------------- grid-split heuristic
def _tensorcores_per_device():
    """TensorCores behind one JAX device.  Robust probing with safe fallback;
    a miss only costs perf (single-core path), never correctness."""
    try:
        info = pltpu.get_tpu_info()
        for attr in ("num_cores", "core_count", "num_tensorcores",
                     "tensor_cores_per_chip", "cores_per_chip"):
            v = getattr(info, attr, None)
            if isinstance(v, int) and v > 0:
                return v
    except Exception:
        pass
    try:
        dev = jax.devices()[0]
        for attr in ("num_cores", "core_count"):
            v = getattr(dev, attr, None)
            if isinstance(v, int) and v > 0:
                return v
        kind = dev.device_kind.lower()
    except Exception:
        return 1
    # Chips whose single JAX device fronts 2 TensorCores (v7x; v4/v5p megacore).
    if any(tag in kind for tag in ("v7", "7x", "v4", "v5p")):
        return 2
    return 1


def _pick_batch_block(B, batch_block):
    if batch_block is not None and 0 < batch_block <= B and B % batch_block == 0:
        return batch_block
    if B > 1 and B % 2 == 0 and _tensorcores_per_device() >= 2:
        # Two fat "parallel" grid steps, one per TensorCore (v7x / megacore).
        return B // 2
    # Single-TC chips (v5e / v6e): one fat grid step over the whole batch.
    return B


# ------------------------------------------------------------------ wrapper
@partial(jax.jit, static_argnames=("batch_block",))
def transformer_decoder_block(x, source, params, *, batch_block=None):
    B, T, D = x.shape
    S = source.shape[1]
    assert D == D_MODEL
    bb = _pick_batch_block(B, batch_block)

    weights = _kernel_params(params, bb)   # 5 packed / pre-transposed operands

    def const_spec(a):
        nd = a.ndim
        return pl.BlockSpec(a.shape, lambda i, _nd=nd: (0,) * _nd)

    in_specs = [
        pl.BlockSpec((bb, T, D), lambda i: (i, 0, 0)),
        pl.BlockSpec((bb, S, D), lambda i: (i, 0, 0)),
    ] + [const_spec(a) for a in weights]

    return pl.pallas_call(
        _make_kernel(bb, T, S),
        out_shape=jax.ShapeDtypeStruct((B, T, D), jnp.float32),
        grid=(B // bb,),
        in_specs=in_specs,
        out_specs=pl.BlockSpec((bb, T, D), lambda i: (i, 0, 0)),
        compiler_params=pltpu.CompilerParams(
            dimension_semantics=("parallel",)),
    )(x, source, *weights)


# --------------------------------------------------------- pure-JAX reference
def _layer_norm_ref(h, g, b):
    mu = jnp.mean(h, axis=-1, keepdims=True)
    var = jnp.mean((h - mu) ** 2, axis=-1, keepdims=True)
    return (h - mu) * lax.rsqrt(var + LN_EPS) * g + b


def _mha_ref(q_in, kv_in, w_in, b_in, w_out, b_out):
    """nn.MultiheadAttention forward (no masks, eval mode)."""
    D = D_MODEL
    q = q_in @ w_in[0:D].T + b_in[:, 0:D]
    k = kv_in @ w_in[D:2 * D].T + b_in[:, D:2 * D]
    v = kv_in @ w_in[2 * D:3 * D].T + b_in[:, 2 * D:3 * D]
    scale = 1.0 / math.sqrt(HEAD_DIM)
    heads = []
    for h in range(NHEAD):
        lo, hi = h * HEAD_DIM, (h + 1) * HEAD_DIM
        s = (q[:, lo:hi] @ k[:, lo:hi].T) * scale
        s = s - jnp.max(s, axis=-1, keepdims=True)
        p = jnp.exp(s)
        p = p / jnp.sum(p, axis=-1, keepdims=True)
        heads.append(p @ v[:, lo:hi])
    o = jnp.concatenate(heads, axis=-1)
    return o @ w_out.T + b_out


def _ref_single(x, src, p):
    h = _layer_norm_ref(x, p["ln_sa_g"], p["ln_sa_b"])
    x = x + p["ls_sa"] * _mha_ref(h, h, p["sa_w_in"], p["sa_b_in"],
                                  p["sa_w_out"], p["sa_b_out"])
    q_in = _layer_norm_ref(x, p["ln_mha_g"], p["ln_mha_b"])
    kv_in = _layer_norm_ref(src, p["ln_enc_g"], p["ln_enc_b"])
    x = x + p["ls_mha"] * _mha_ref(q_in, kv_in, p["mha_w_in"], p["mha_b_in"],
                                   p["mha_w_out"], p["mha_b_out"])
    h = _layer_norm_ref(x, p["ln_ff_g"], p["ln_ff_b"])
    h1 = jnp.maximum(h @ p["ff_w1"].T + p["ff_b1"], 0.0)
    x = x + p["ls_ff"] * (h1 @ p["ff_w2"].T + p["ff_b2"])
    return x


if __name__ == "__main__":
    key = jax.random.PRNGKey(0)
    k_x, k_s, k_p = jax.random.split(key, 3)

    B, T, S, D = 2, 8, 16, D_MODEL
    x = jax.random.normal(k_x, (B, T, D), dtype=jnp.float32)
    source = jax.random.normal(k_s, (B, S, D), dtype=jnp.float32)
    params = init_params(k_p)

    out = jax.block_until_ready(transformer_decoder_block(x, source, params))

    ref = jax.vmap(lambda xb, sb: _ref_single(xb, sb, params))(x, source)
    np.testing.assert_allclose(np.asarray(out), np.asarray(ref),
                               atol=1e-3, rtol=1e-3)

    print("KERNEL_OK")
</pallas_src>

<mosaic_0001>
module attributes {stable_mosaic.version = 11 : i64} {
  func.func @kernel(%arg0: i32, %arg1: memref<2x8x32xf32, #tpu.memory_space<vmem>>, %arg2: memref<2x16x32xf32, #tpu.memory_space<vmem>>, %arg3: memref<2x2x96x32xf32, #tpu.memory_space<vmem>>, %arg4: memref<2x96x1xf32, #tpu.memory_space<vmem>>, %arg5: memref<2x2x32x32xf32, #tpu.memory_space<vmem>>, %arg6: memref<2x32x32xf32, #tpu.memory_space<vmem>>, %arg7: memref<15x32xf32, #tpu.memory_space<vmem>>, %arg8: memref<2x8x32xf32, #tpu.memory_space<vmem>>) attributes {dimension_semantics = [#tpu.dimension_semantics<parallel>], iteration_bounds = array<i64: 1>, scalar_prefetch = 0 : i64, scratch_operands = 0 : i64, tpu.core_type = #tpu.core_type<tc>, window_params = [{transform_indices = @transform_0, window_bounds = array<i64: 2, 8, 32>}, {transform_indices = @transform_1, window_bounds = array<i64: 2, 16, 32>}, {pipeline_mode = #tpu.pipeline_mode<synchronous>, transform_indices = @transform_2, window_bounds = array<i64: 2, 2, 96, 32>}, {pipeline_mode = #tpu.pipeline_mode<synchronous>, transform_indices = @transform_3, window_bounds = array<i64: 2, 96, 1>}, {pipeline_mode = #tpu.pipeline_mode<synchronous>, transform_indices = @transform_4, window_bounds = array<i64: 2, 2, 32, 32>}, {pipeline_mode = #tpu.pipeline_mode<synchronous>, transform_indices = @transform_5, window_bounds = array<i64: 2, 32, 32>}, {pipeline_mode = #tpu.pipeline_mode<synchronous>, transform_indices = @transform_6, window_bounds = array<i64: 15, 32>}, {transform_indices = @transform_7, window_bounds = array<i64: 2, 8, 32>}]} {
    %c0 = arith.constant 0 : index
    %c0_0 = arith.constant 0 : index
    %c0_1 = arith.constant 0 : index
    %0 = vector.load %arg1[%c0, %c0_0, %c0_1] : memref<2x8x32xf32, #tpu.memory_space<vmem>>, vector<2x8x32xf32>
    %1 = vector.shape_cast %0 : vector<2x8x32xf32> to vector<16x32xf32>
    %c0_2 = arith.constant 0 : index
    %c0_3 = arith.constant 0 : index
    %c0_4 = arith.constant 0 : index
    %2 = vector.load %arg2[%c0_2, %c0_3, %c0_4] : memref<2x16x32xf32, #tpu.memory_space<vmem>>, vector<2x16x32xf32>
    %3 = vector.shape_cast %2 : vector<2x16x32xf32> to vector<32x32xf32>
    %c0_5 = arith.constant 0 : index
    %c0_6 = arith.constant 0 : index
    %4 = vector.load %arg7[%c0_5, %c0_6] : memref<15x32xf32, #tpu.memory_space<vmem>>, vector<15x32xf32>
    %cst = arith.constant dense<0.000000e+00> : vector<16xf32>
    %5 = vector.multi_reduction <add>, %1, %cst [1] : vector<16x32xf32> to vector<16xf32>
    %6 = vector.shape_cast %5 : vector<16xf32> to vector<16x1xf32>
    %cst_7 = arith.constant 3.200000e+01 : f32
    %7 = vector.broadcast %cst_7 : f32 to vector<16x1xf32>
    %8 = arith.divf %6, %7 : vector<16x1xf32>
    %9 = arith.mulf %1, %1 : vector<16x32xf32>
    %cst_8 = arith.constant dense<0.000000e+00> : vector<16xf32>
    %10 = vector.multi_reduction <add>, %9, %cst_8 [1] : vector<16x32xf32> to vector<16xf32>
    %11 = vector.shape_cast %10 : vector<16xf32> to vector<16x1xf32>
    %cst_9 = arith.constant 3.200000e+01 : f32
    %12 = vector.broadcast %cst_9 : f32 to vector<16x1xf32>
    %13 = arith.divf %11, %12 : vector<16x1xf32>
    %14 = arith.mulf %8, %8 : vector<16x1xf32>
    %15 = arith.subf %13, %14 : vector<16x1xf32>
    %cst_10 = arith.constant 9.99999974E-6 : f32
    %16 = vector.broadcast %cst_10 : f32 to vector<16x1xf32>
    %17 = arith.addf %15, %16 : vector<16x1xf32>
    %18 = math.rsqrt %17 : vector<16x1xf32>
    %19 = vector.broadcast %8 : vector<16x1xf32> to vector<16x32xf32>
    %20 = arith.subf %1, %19 : vector<16x32xf32>
    %21 = vector.broadcast %18 : vector<16x1xf32> to vector<16x32xf32>
    %22 = arith.mulf %20, %21 : vector<16x32xf32>
    %23 = vector.extract_strided_slice %4 {offsets = [0, 0], sizes = [1, 32], strides = [1, 1]} : vector<15x32xf32> to vector<1x32xf32>
    %24 = vector.broadcast %23 : vector<1x32xf32> to vector<16x32xf32>
    %25 = arith.mulf %22, %24 : vector<16x32xf32>
    %26 = vector.extract_strided_slice %4 {offsets = [1, 0], sizes = [1, 32], strides = [1, 1]} : vector<15x32xf32> to vector<1x32xf32>
    %27 = vector.broadcast %26 : vector<1x32xf32> to vector<16x32xf32>
    %28 = arith.addf %25, %27 : vector<16x32xf32>
    %c0_11 = arith.constant 0 : index
    %c0_12 = arith.constant 0 : index
    %c0_13 = arith.constant 0 : index
    %c0_14 = arith.constant 0 : index
    %29 = vector.load %arg3[%c0_11, %c0_12, %c0_13, %c0_14] : memref<2x2x96x32xf32, #tpu.memory_space<vmem>>, vector<1x2x96x32xf32>
    %30 = vector.shape_cast %29 : vector<1x2x96x32xf32> to vector<2x96x32xf32>
    %c0_15 = arith.constant 0 : index
    %c0_16 = arith.constant 0 : index
    %c0_17 = arith.constant 0 : index
    %31 = vector.load %arg4[%c0_15, %c0_16, %c0_17] : memref<2x96x1xf32, #tpu.memory_space<vmem>>, vector<1x96x1xf32>
    %32 = vector.shape_cast %31 : vector<1x96x1xf32> to vector<96x1xf32>
    %c0_18 = arith.constant 0 : index
    %c0_19 = arith.constant 0 : index
    %c0_20 = arith.constant 0 : index
    %c0_21 = arith.constant 0 : index
    %33 = vector.load %arg5[%c0_18, %c0_19, %c0_20, %c0_21] : memref<2x2x32x32xf32, #tpu.memory_space<vmem>>, vector<1x2x32x32xf32>
    %34 = vector.shape_cast %33 : vector<1x2x32x32xf32> to vector<2x32x32xf32>
    %35 = vector.shape_cast %28 : vector<16x32xf32> to vector<2x8x32xf32>
    %cst_22 = arith.constant dense<0.000000e+00> : vector<2x96x8xf32>
    %36 = tpu.matmul %30, %35, %cst_22 {dimension_numbers = #tpu.dot_dimension_numbers<[2], [2], [1], [1], [0, 0, 0, 1, 1, 1], [0], [0]>} : vector<2x96x32xf32>, vector<2x8x32xf32>, vector<2x96x8xf32> -> vector<2x96x8xf32>
    %37 = vector.shape_cast %32 : vector<96x1xf32> to vector<1x96x1xf32>
    %38 = vector.broadcast %37 : vector<1x96x1xf32> to vector<2x96x8xf32>
    %39 = arith.addf %36, %38 : vector<2x96x8xf32>
    %40 = vector.extract_strided_slice %39 {offsets = [0, 0, 0], sizes = [2, 32, 8], strides = [1, 1, 1]} : vector<2x96x8xf32> to vector<2x32x8xf32>
    %41 = vector.extract_strided_slice %39 {offsets = [0, 32, 0], sizes = [2, 32, 8], strides = [1, 1, 1]} : vector<2x96x8xf32> to vector<2x32x8xf32>
    %42 = vector.extract_strided_slice %39 {offsets = [0, 64, 0], sizes = [2, 32, 8], strides = [1, 1, 1]} : vector<2x96x8xf32> to vector<2x32x8xf32>
    %43 = vector.shape_cast %40 : vector<2x32x8xf32> to vector<8x8x8xf32>
    %44 = vector.shape_cast %41 : vector<2x32x8xf32> to vector<8x8x8xf32>
    %45 = vector.shape_cast %42 : vector<2x32x8xf32> to vector<8x8x8xf32>
    %cst_23 = arith.constant dense<0.000000e+00> : vector<8x8x8xf32>
    %46 = tpu.matmul %43, %44, %cst_23 {dimension_numbers = #tpu.dot_dimension_numbers<[1], [1], [2], [2], [0, 0, 0, 2, 1, 2], [0], [0]>} : vector<8x8x8xf32>, vector<8x8x8xf32>, vector<8x8x8xf32> -> vector<8x8x8xf32>
    %cst_24 = arith.constant dense<0xFF800000> : vector<8x8xf32>
    %47 = vector.multi_reduction <maximumf>, %46, %cst_24 [2] : vector<8x8x8xf32> to vector<8x8xf32>
    %48 = vector.shape_cast %47 : vector<8x8xf32> to vector<8x8x1xf32>
    %49 = vector.broadcast %48 : vector<8x8x1xf32> to vector<8x8x8xf32>
    %50 = arith.subf %46, %49 : vector<8x8x8xf32>
    %51 = math.exp %50 : vector<8x8x8xf32>
    %cst_25 = arith.constant dense<0.000000e+00> : vector<8x8xf32>
    %52 = vector.multi_reduction <add>, %51, %cst_25 [2] : vector<8x8x8xf32> to vector<8x8xf32>
    %53 = vector.shape_cast %52 : vector<8x8xf32> to vector<8x8x1xf32>
    %54 = tpu.reciprocal %53 {approx = true} : vector<8x8x1xf32> -> vector<8x8x1xf32>
    %55 = vector.broadcast %54 : vector<8x8x1xf32> to vector<8x8x8xf32>
    %56 = arith.mulf %51, %55 : vector<8x8x8xf32>
    %cst_26 = arith.constant dense<0.000000e+00> : vector<8x8x8xf32>
    %57 = tpu.matmul %45, %56, %cst_26 {dimension_numbers = #tpu.dot_dimension_numbers<[2], [2], [1], [1], [0, 0, 0, 1, 1, 1], [0], [0]>} : vector<8x8x8xf32>, vector<8x8x8xf32>, vector<8x8x8xf32> -> vector<8x8x8xf32>
    %58 = vector.shape_cast %57 : vector<8x8x8xf32> to vector<2x32x8xf32>
    %cst_27 = arith.constant dense<0.000000e+00> : vector<2x8x32xf32>
    %59 = tpu.matmul %58, %34, %cst_27 {dimension_numbers = #tpu.dot_dimension_numbers<[1], [1], [2], [2], [0, 0, 0, 2, 1, 2], [0], [0]>} : vector<2x32x8xf32>, vector<2x32x32xf32>, vector<2x8x32xf32> -> vector<2x8x32xf32>
    %60 = vector.shape_cast %59 : vector<2x8x32xf32> to vector<16x32xf32>
    %61 = vector.extract_strided_slice %4 {offsets = [11, 0], sizes = [1, 32], strides = [1, 1]} : vector<15x32xf32> to vector<1x32xf32>
    %62 = vector.broadcast %61 : vector<1x32xf32> to vector<16x32xf32>
    %63 = arith.addf %60, %62 : vector<16x32xf32>
    %64 = vector.extract_strided_slice %4 {offsets = [8, 0], sizes = [1, 32], strides = [1, 1]} : vector<15x32xf32> to vector<1x32xf32>
    %65 = vector.broadcast %64 : vector<1x32xf32> to vector<16x32xf32>
    %66 = arith.mulf %65, %63 : vector<16x32xf32>
    %67 = arith.addf %1, %66 : vector<16x32xf32>
    %cst_28 = arith.constant dense<0.000000e+00> : vector<16xf32>
    %68 = vector.multi_reduction <add>, %67, %cst_28 [1] : vector<16x32xf32> to vector<16xf32>
    %69 = vector.shape_cast %68 : vector<16xf32> to vector<16x1xf32>
    %cst_29 = arith.constant 3.200000e+01 : f32
    %70 = vector.broadcast %cst_29 : f32 to vector<16x1xf32>
    %71 = arith.divf %69, %70 : vector<16x1xf32>
    %72 = arith.mulf %67, %67 : vector<16x32xf32>
    %cst_30 = arith.constant dense<0.000000e+00> : vector<16xf32>
    %73 = vector.multi_reduction <add>, %72, %cst_30 [1] : vector<16x32xf32> to vector<16xf32>
    %74 = vector.shape_cast %73 : vector<16xf32> to vector<16x1xf32>
    %cst_31 = arith.constant 3.200000e+01 : f32
    %75 = vector.broadcast %cst_31 : f32 to vector<16x1xf32>
    %76 = arith.divf %74, %75 : vector<16x1xf32>
    %77 = arith.mulf %71, %71 : vector<16x1xf32>
    %78 = arith.subf %76, %77 : vector<16x1xf32>
    %cst_32 = arith.constant 9.99999974E-6 : f32
    %79 = vector.broadcast %cst_32 : f32 to vector<16x1xf32>
    %80 = arith.addf %78, %79 : vector<16x1xf32>
    %81 = math.rsqrt %80 : vector<16x1xf32>
    %82 = vector.broadcast %71 : vector<16x1xf32> to vector<16x32xf32>
    %83 = arith.subf %67, %82 : vector<16x32xf32>
    %84 = vector.broadcast %81 : vector<16x1xf32> to vector<16x32xf32>
    %85 = arith.mulf %83, %84 : vector<16x32xf32>
    %86 = vector.extract_strided_slice %4 {offsets = [2, 0], sizes = [1, 32], strides = [1, 1]} : vector<15x32xf32> to vector<1x32xf32>
    %87 = vector.broadcast %86 : vector<1x32xf32> to vector<16x32xf32>
    %88 = arith.mulf %85, %87 : vector<16x32xf32>
    %89 = vector.extract_strided_slice %4 {offsets = [3, 0], sizes = [1, 32], strides = [1, 1]} : vector<15x32xf32> to vector<1x32xf32>
    %90 = vector.broadcast %89 : vector<1x32xf32> to vector<16x32xf32>
    %91 = arith.addf %88, %90 : vector<16x32xf32>
    %cst_33 = arith.constant dense<0.000000e+00> : vector<32xf32>
    %92 = vector.multi_reduction <add>, %3, %cst_33 [1] : vector<32x32xf32> to vector<32xf32>
    %93 = vector.shape_cast %92 : vector<32xf32> to vector<32x1xf32>
    %cst_34 = arith.constant 3.200000e+01 : f32
    %94 = vector.broadcast %cst_34 : f32 to vector<32x1xf32>
    %95 = arith.divf %93, %94 : vector<32x1xf32>
    %96 = arith.mulf %3, %3 : vector<32x32xf32>
    %cst_35 = arith.constant dense<0.000000e+00> : vector<32xf32>
    %97 = vector.multi_reduction <add>, %96, %cst_35 [1] : vector<32x32xf32> to vector<32xf32>
    %98 = vector.shape_cast %97 : vector<32xf32> to vector<32x1xf32>
    %cst_36 = arith.constant 3.200000e+01 : f32
    %99 = vector.broadcast %cst_36 : f32 to vector<32x1xf32>
    %100 = arith.divf %98, %99 : vector<32x1xf32>
    %101 = arith.mulf %95, %95 : vector<32x1xf32>
    %102 = arith.subf %100, %101 : vector<32x1xf32>
    %cst_37 = arith.constant 9.99999974E-6 : f32
    %103 = vector.broadcast %cst_37 : f32 to vector<32x1xf32>
    %104 = arith.addf %102, %103 : vector<32x1xf32>
    %105 = math.rsqrt %104 : vector<32x1xf32>
    %106 = vector.broadcast %95 : vector<32x1xf32> to vector<32x32xf32>
    %107 = arith.subf %3, %106 : vector<32x32xf32>
    %108 = vector.broadcast %105 : vector<32x1xf32> to vector<32x32xf32>
    %109 = arith.mulf %107, %108 : vector<32x32xf32>
    %110 = vector.extract_strided_slice %4 {offsets = [4, 0], sizes = [1, 32], strides = [1, 1]} : vector<15x32xf32> to vector<1x32xf32>
    %111 = vector.broadcast %110 : vector<1x32xf32> to vector<32x32xf32>
    %112 = arith.mulf %109, %111 : vector<32x32xf32>
    %113 = vector.extract_strided_slice %4 {offsets = [5, 0], sizes = [1, 32], strides = [1, 1]} : vector<15x32xf32> to vector<1x32xf32>
    %114 = vector.broadcast %113 : vector<1x32xf32> to vector<32x32xf32>
    %115 = arith.addf %112, %114 : vector<32x32xf32>
    %c1 = arith.constant 1 : index
    %c0_38 = arith.constant 0 : index
    %c0_39 = arith.constant 0 : index
    %c0_40 = arith.constant 0 : index
    %116 = vector.load %arg3[%c1, %c0_38, %c0_39, %c0_40] : memref<2x2x96x32xf32, #tpu.memory_space<vmem>>, vector<1x2x96x32xf32>
    %117 = vector.shape_cast %116 : vector<1x2x96x32xf32> to vector<2x96x32xf32>
    %c1_41 = arith.constant 1 : index
    %c0_42 = arith.constant 0 : index
    %c0_43 = arith.constant 0 : index
    %118 = vector.load %arg4[%c1_41, %c0_42, %c0_43] : memref<2x96x1xf32, #tpu.memory_space<vmem>>, vector<1x96x1xf32>
    %119 = vector.shape_cast %118 : vector<1x96x1xf32> to vector<96x1xf32>
    %c1_44 = arith.constant 1 : index
    %c0_45 = arith.constant 0 : index
    %c0_46 = arith.constant 0 : index
    %c0_47 = arith.constant 0 : index
    %120 = vector.load %arg5[%c1_44, %c0_45, %c0_46, %c0_47] : memref<2x2x32x32xf32, #tpu.memory_space<vmem>>, vector<1x2x32x32xf32>
    %121 = vector.shape_cast %120 : vector<1x2x32x32xf32> to vector<2x32x32xf32>
    %122 = vector.extract_strided_slice %117 {offsets = [0, 0, 0], sizes = [2, 32, 32], strides = [1, 1, 1]} : vector<2x96x32xf32> to vector<2x32x32xf32>
    %123 = vector.extract_strided_slice %119 {offsets = [0, 0], sizes = [32, 1], strides = [1, 1]} : vector<96x1xf32> to vector<32x1xf32>
    %124 = vector.shape_cast %91 : vector<16x32xf32> to vector<2x8x32xf32>
    %cst_48 = arith.constant dense<0.000000e+00> : vector<2x32x8xf32>
    %125 = tpu.matmul %122, %124, %cst_48 {dimension_numbers = #tpu.dot_dimension_numbers<[2], [2], [1], [1], [0, 0, 0, 1, 1, 1], [0], [0]>} : vector<2x32x32xf32>, vector<2x8x32xf32>, vector<2x32x8xf32> -> vector<2x32x8xf32>
    %126 = vector.shape_cast %123 : vector<32x1xf32> to vector<1x32x1xf32>
    %127 = vector.broadcast %126 : vector<1x32x1xf32> to vector<2x32x8xf32>
    %128 = arith.addf %125, %127 : vector<2x32x8xf32>
    %129 = vector.extract_strided_slice %117 {offsets = [0, 32, 0], sizes = [2, 64, 32], strides = [1, 1, 1]} : vector<2x96x32xf32> to vector<2x64x32xf32>
    %130 = vector.extract_strided_slice %119 {offsets = [32, 0], sizes = [64, 1], strides = [1, 1]} : vector<96x1xf32> to vector<64x1xf32>
    %131 = vector.shape_cast %115 : vector<32x32xf32> to vector<2x16x32xf32>
    %cst_49 = arith.constant dense<0.000000e+00> : vector<2x64x16xf32>
    %132 = tpu.matmul %129, %131, %cst_49 {dimension_numbers = #tpu.dot_dimension_numbers<[2], [2], [1], [1], [0, 0, 0, 1, 1, 1], [0], [0]>} : vector<2x64x32xf32>, vector<2x16x32xf32>, vector<2x64x16xf32> -> vector<2x64x16xf32>
    %133 = vector.shape_cast %130 : vector<64x1xf32> to vector<1x64x1xf32>
    %134 = vector.broadcast %133 : vector<1x64x1xf32> to vector<2x64x16xf32>
    %135 = arith.addf %132, %134 : vector<2x64x16xf32>
    %136 = vector.extract_strided_slice %135 {offsets = [0, 0, 0], sizes = [2, 32, 16], strides = [1, 1, 1]} : vector<2x64x16xf32> to vector<2x32x16xf32>
    %137 = vector.extract_strided_slice %135 {offsets = [0, 32, 0], sizes = [2, 32, 16], strides = [1, 1, 1]} : vector<2x64x16xf32> to vector<2x32x16xf32>
    %138 = vector.shape_cast %128 : vector<2x32x8xf32> to vector<8x8x8xf32>
    %139 = vector.shape_cast %136 : vector<2x32x16xf32> to vector<8x8x16xf32>
    %140 = vector.shape_cast %137 : vector<2x32x16xf32> to vector<8x8x16xf32>
    %cst_50 = arith.constant dense<0.000000e+00> : vector<8x8x16xf32>
    %141 = tpu.matmul %138, %139, %cst_50 {dimension_numbers = #tpu.dot_dimension_numbers<[1], [1], [2], [2], [0, 0, 0, 2, 1, 2], [0], [0]>} : vector<8x8x8xf32>, vector<8x8x16xf32>, vector<8x8x16xf32> -> vector<8x8x16xf32>
    %cst_51 = arith.constant dense<0xFF800000> : vector<8x8xf32>
    %142 = vector.multi_reduction <maximumf>, %141, %cst_51 [2] : vector<8x8x16xf32> to vector<8x8xf32>
    %143 = vector.shape_cast %142 : vector<8x8xf32> to vector<8x8x1xf32>
    %144 = vector.broadcast %143 : vector<8x8x1xf32> to vector<8x8x16xf32>
    %145 = arith.subf %141, %144 : vector<8x8x16xf32>
    %146 = math.exp %145 : vector<8x8x16xf32>
    %cst_52 = arith.constant dense<0.000000e+00> : vector<8x8xf32>
    %147 = vector.multi_reduction <add>, %146, %cst_52 [2] : vector<8x8x16xf32> to vector<8x8xf32>
    %148 = vector.shape_cast %147 : vector<8x8xf32> to vector<8x8x1xf32>
    %149 = tpu.reciprocal %148 {approx = true} : vector<8x8x1xf32> -> vector<8x8x1xf32>
    %150 = vector.broadcast %149 : vector<8x8x1xf32> to vector<8x8x16xf32>
    %151 = arith.mulf %146, %150 : vector<8x8x16xf32>
    %cst_53 = arith.constant dense<0.000000e+00> : vector<8x8x8xf32>
    %152 = tpu.matmul %140, %151, %cst_53 {dimension_numbers = #tpu.dot_dimension_numbers<[2], [2], [1], [1], [0, 0, 0, 1, 1, 1], [0], [0]>} : vector<8x8x16xf32>, vector<8x8x16xf32>, vector<8x8x8xf32> -> vector<8x8x8xf32>
    %153 = vector.shape_cast %152 : vector<8x8x8xf32> to vector<2x32x8xf32>
    %cst_54 = arith.constant dense<0.000000e+00> : vector<2x8x32xf32>
    %154 = tpu.matmul %153, %121, %cst_54 {dimension_numbers = #tpu.dot_dimension_numbers<[1], [1], [2], [2], [0, 0, 0, 2, 1, 2], [0], [0]>} : vector<2x32x8xf32>, vector<2x32x32xf32>, vector<2x8x32xf32> -> vector<2x8x32xf32>
    %155 = vector.shape_cast %154 : vector<2x8x32xf32> to vector<16x32xf32>
    %156 = vector.extract_strided_slice %4 {offsets = [12, 0], sizes = [1, 32], strides = [1, 1]} : vector<15x32xf32> to vector<1x32xf32>
    %157 = vector.broadcast %156 : vector<1x32xf32> to vector<16x32xf32>
    %158 = arith.addf %155, %157 : vector<16x32xf32>
    %159 = vector.extract_strided_slice %4 {offsets = [9, 0], sizes = [1, 32], strides = [1, 1]} : vector<15x32xf32> to vector<1x32xf32>
    %160 = vector.broadcast %159 : vector<1x32xf32> to vector<16x32xf32>
    %161 = arith.mulf %160, %158 : vector<16x32xf32>
    %162 = arith.addf %67, %161 : vector<16x32xf32>
    %cst_55 = arith.constant dense<0.000000e+00> : vector<16xf32>
    %163 = vector.multi_reduction <add>, %162, %cst_55 [1] : vector<16x32xf32> to vector<16xf32>
    %164 = vector.shape_cast %163 : vector<16xf32> to vector<16x1xf32>
    %cst_56 = arith.constant 3.200000e+01 : f32
    %165 = vector.broadcast %cst_56 : f32 to vector<16x1xf32>
    %166 = arith.divf %164, %165 : vector<16x1xf32>
    %167 = arith.mulf %162, %162 : vector<16x32xf32>
    %cst_57 = arith.constant dense<0.000000e+00> : vector<16xf32>
    %168 = vector.multi_reduction <add>, %167, %cst_57 [1] : vector<16x32xf32> to vector<16xf32>
    %169 = vector.shape_cast %168 : vector<16xf32> to vector<16x1xf32>
    %cst_58 = arith.constant 3.200000e+01 : f32
    %170 = vector.broadcast %cst_58 : f32 to vector<16x1xf32>
    %171 = arith.divf %169, %170 : vector<16x1xf32>
    %172 = arith.mulf %166, %166 : vector<16x1xf32>
    %173 = arith.subf %171, %172 : vector<16x1xf32>
    %cst_59 = arith.constant 9.99999974E-6 : f32
    %174 = vector.broadcast %cst_59 : f32 to vector<16x1xf32>
    %175 = arith.addf %173, %174 : vector<16x1xf32>
    %176 = math.rsqrt %175 : vector<16x1xf32>
    %177 = vector.broadcast %166 : vector<16x1xf32> to vector<16x32xf32>
    %178 = arith.subf %162, %177 : vector<16x32xf32>
    %179 = vector.broadcast %176 : vector<16x1xf32> to vector<16x32xf32>
    %180 = arith.mulf %178, %179 : vector<16x32xf32>
    %181 = vector.extract_strided_slice %4 {offsets = [6, 0], sizes = [1, 32], strides = [1, 1]} : vector<15x32xf32> to vector<1x32xf32>
    %182 = vector.broadcast %181 : vector<1x32xf32> to vector<16x32xf32>
    %183 = arith.mulf %180, %182 : vector<16x32xf32>
    %184 = vector.extract_strided_slice %4 {offsets = [7, 0], sizes = [1, 32], strides = [1, 1]} : vector<15x32xf32> to vector<1x32xf32>
    %185 = vector.broadcast %184 : vector<1x32xf32> to vector<16x32xf32>
    %186 = arith.addf %183, %185 : vector<16x32xf32>
    %c0_60 = arith.constant 0 : index
    %c0_61 = arith.constant 0 : index
    %c0_62 = arith.constant 0 : index
    %187 = vector.load %arg6[%c0_60, %c0_61, %c0_62] : memref<2x32x32xf32, #tpu.memory_space<vmem>>, vector<1x32x32xf32>
    %188 = vector.shape_cast %187 : vector<1x32x32xf32> to vector<32x32xf32>
    %cst_63 = arith.constant dense<0.000000e+00> : vector<16x32xf32>
    %189 = tpu.matmul %186, %188, %cst_63 {dimension_numbers = #tpu.dot_dimension_numbers<[1], [0], [0], [1], [0, 0, 1, 1], [], []>} : vector<16x32xf32>, vector<32x32xf32>, vector<16x32xf32> -> vector<16x32xf32>
    %190 = vector.extract_strided_slice %4 {offsets = [13, 0], sizes = [1, 32], strides = [1, 1]} : vector<15x32xf32> to vector<1x32xf32>
    %191 = vector.broadcast %190 : vector<1x32xf32> to vector<16x32xf32>
    %192 = arith.addf %189, %191 : vector<16x32xf32>
    %cst_64 = arith.constant 0.000000e+00 : f32
    %193 = vector.broadcast %cst_64 : f32 to vector<16x32xf32>
    %194 = arith.maximumf %192, %193 : vector<16x32xf32>
    %c1_65 = arith.constant 1 : index
    %c0_66 = arith.constant 0 : index
    %c0_67 = arith.constant 0 : index
    %195 = vector.load %arg6[%c1_65, %c0_66, %c0_67] : memref<2x32x32xf32, #tpu.memory_space<vmem>>, vector<1x32x32xf32>
    %196 = vector.shape_cast %195 : vector<1x32x32xf32> to vector<32x32xf32>
    %cst_68 = arith.constant dense<0.000000e+00> : vector<16x32xf32>
    %197 = tpu.matmul %194, %196, %cst_68 {dimension_numbers = #tpu.dot_dimension_numbers<[1], [0], [0], [1], [0, 0, 1, 1], [], []>} : vector<16x32xf32>, vector<32x32xf32>, vector<16x32xf32> -> vector<16x32xf32>
    %198 = vector.extract_strided_slice %4 {offsets = [14, 0], sizes = [1, 32], strides = [1, 1]} : vector<15x32xf32> to vector<1x32xf32>
    %199 = vector.broadcast %198 : vector<1x32xf32> to vector<16x32xf32>
    %200 = arith.addf %197, %199 : vector<16x32xf32>
    %201 = vector.extract_strided_slice %4 {offsets = [10, 0], sizes = [1, 32], strides = [1, 1]} : vector<15x32xf32> to vector<1x32xf32>
    %202 = vector.broadcast %201 : vector<1x32xf32> to vector<16x32xf32>
    %203 = arith.mulf %202, %200 : vector<16x32xf32>
    %204 = arith.addf %162, %203 : vector<16x32xf32>
    %205 = vector.shape_cast %204 : vector<16x32xf32> to vector<2x8x32xf32>
    %c0_69 = arith.constant 0 : index
    %c0_70 = arith.constant 0 : index
    %c0_71 = arith.constant 0 : index
    %206 = vector.load %arg8[%c0_69, %c0_70, %c0_71] : memref<2x8x32xf32, #tpu.memory_space<vmem>>, vector<2x8x32xf32>
    tpu.vector_store %arg8[%c0_69, %c0_70, %c0_71], %205 {strides = array<i32>} : memref<2x8x32xf32, #tpu.memory_space<vmem>>, vector<2x8x32xf32>,
    return
  }
  func.func @transform_0(%arg0: i32) -> (i32, i32, i32) {
    %c0_i32 = arith.constant 0 : i32
    %c0_i32_0 = arith.constant 0 : i32
    %c0_i32_1 = arith.constant 0 : i32
    return %arg0, %c0_i32, %c0_i32_0 : i32, i32, i32
  }
  func.func @transform_1(%arg0: i32) -> (i32, i32, i32) {
    %c0_i32 = arith.constant 0 : i32
    %c0_i32_0 = arith.constant 0 : i32
    %c0_i32_1 = arith.constant 0 : i32
    return %arg0, %c0_i32, %c0_i32_0 : i32, i32, i32
  }
  func.func @transform_2(%arg0: i32) -> (i32, i32, i32, i32) {
    %c0_i32 = arith.constant 0 : i32
    %c0_i32_0 = arith.constant 0 : i32
    %c0_i32_1 = arith.constant 0 : i32
    %c0_i32_2 = arith.constant 0 : i32
    %c0_i32_3 = arith.constant 0 : i32
    return %c0_i32, %c0_i32_0, %c0_i32_1, %c0_i32_2 : i32, i32, i32, i32
  }
  func.func @transform_3(%arg0: i32) -> (i32, i32, i32) {
    %c0_i32 = arith.constant 0 : i32
    %c0_i32_0 = arith.constant 0 : i32
    %c0_i32_1 = arith.constant 0 : i32
    %c0_i32_2 = arith.constant 0 : i32
    return %c0_i32, %c0_i32_0, %c0_i32_1 : i32, i32, i32
  }
  func.func @transform_4(%arg0: i32) -> (i32, i32, i32, i32) {
    %c0_i32 = arith.constant 0 : i32
    %c0_i32_0 = arith.constant 0 : i32
    %c0_i32_1 = arith.constant 0 : i32
    %c0_i32_2 = arith.constant 0 : i32
    %c0_i32_3 = arith.constant 0 : i32
    return %c0_i32, %c0_i32_0, %c0_i32_1, %c0_i32_2 : i32, i32, i32, i32
  }
  func.func @transform_5(%arg0: i32) -> (i32, i32, i32) {
    %c0_i32 = arith.constant 0 : i32
    %c0_i32_0 = arith.constant 0 : i32
    %c0_i32_1 = arith.constant 0 : i32
    %c0_i32_2 = arith.constant 0 : i32
    return %c0_i32, %c0_i32_0, %c0_i32_1 : i32, i32, i32
  }
  func.func @transform_6(%arg0: i32) -> (i32, i32) {
    %c0_i32 = arith.constant 0 : i32
    %c0_i32_0 = arith.constant 0 : i32
    %c0_i32_1 = arith.constant 0 : i32
    return %c0_i32, %c0_i32_0 : i32, i32
  }
  func.func @transform_7(%arg0: i32) -> (i32, i32, i32) {
    %c0_i32 = arith.constant 0 : i32
    %c0_i32_0 = arith.constant 0 : i32
    %c0_i32_1 = arith.constant 0 : i32
    return %arg0, %c0_i32, %c0_i32_0 : i32, i32, i32
  }
}

</mosaic_0001>

<bundles_post_ra>
// kernel: transformer_decoder_block.1
= control target key start
LH: loop header
LB: loop body
LE: loop exit
PB: predicated region body
PF: predicated region fallthrough
CT: control target
= control target key end

     0   :  { %vm35_vm0 = vcmask 261120   ;;  %s6645_s0 = inlined_call_operand.vmem [shape: f32[2,8,32], index: 0, kind: input, shape index: {}]   ;;  %s6646_s1 = inlined_call_operand.vmem [shape: f32[2,16,32], index: 1, kind: input, shape index: {}]   ;;  %s6647_s2 = inlined_call_operand.vmem [shape: f32[2,2,96,32], index: 2, kind: input, shape index: {}]   ;;  %s6648_s3 = inlined_call_operand.vmem [shape: f32[2,96,1], index: 3, kind: input, shape index: {}]   ;;  %s6649_s4 = inlined_call_operand.vmem [shape: f32[2,2,32,32], index: 4, kind: input, shape index: {}]   ;;  %s6650_s5 = inlined_call_operand.vmem [shape: f32[2,32,32], index: 5, kind: input, shape index: {}]   ;;  %s6651_s6 = inlined_call_operand.vmem [shape: f32[15,32], index: 6, kind: input, shape index: {}]   ;;  %s6652_s7 = inlined_call_operand.hbm [shape: f32[2,8,32], index: 7, kind: output, shape index: {}]  }
   0x1   :  { %v5824_v0 = vld [vmem:[%s6645_s0 + $0x8] sm:$0xff]  ;;  %v5829_v1 = vld [vmem:[%s6645_s0] sm:$0xff] }
   0x2   :  { %12 = vsyncpa [#allocation3], 0  ;;  %v39_v2 = vsel %vm35_vm0, %v5824_v0, 0.0  ;;  %v36_v3 = vsel %vm35_vm0, %v5829_v1, 0.0  ;;  %v46_v4 = vmul.f32 %v5824_v0, %v5824_v0  ;;  %v45_v5 = vmul.f32 %v5829_v1, %v5829_v1  ;;  %v79_v8 = vld [vmem:[%s6647_s2] sm:$0xff]  ;;  %v104_v10 = vld [vmem:[%s6648_s3 + $0x8] sm:$0xff] }
   0x3   :  { %40 = vadd.xlane.f32.xlu1 %v39_v2  ;;  %37 = vadd.xlane.f32.xlu0 %v36_v3  ;;  %v91_v9 = vld [vmem:[%s6647_s2 + $0x60] sm:$0xff]  ;;  %v5774_v11 = vmov 0   ;;  %v105_v13 = vld [vmem:[%s6648_s3 + $0x10] sm:$0xff]  ;;  %v106_v14 = vld [vmem:[%s6648_s3 + $0x18] sm:$0xff]  ;;  %v67_v31 = vlaneseq  ;;  %v5775_v2 = vmov 0.0   ;;  %vm5776_vm1 = vmmov 0  }
   0x4   :  { %v50_v6 = vsel %vm35_vm0, %v46_v4, 0.0  ;;  %v47_v7 = vsel %vm35_vm0, %v45_v5, 0.0  ;;  %5291 = vmatprep.mubr.msk.f32.mxu0 %vm35_vm0, %v79_v8  ;;  %5311 = vmatprep.mubr.msk.f32.mxu1 %vm35_vm0, %v91_v9  ;;  %v103_v12 = vld [vmem:[%s6648_s3] sm:$0xff]  ;;  %v108_v16 = vld [vmem:[%s6648_s3 + $0x28] sm:$0xff]  ;;  %v109_v17 = vld [vmem:[%s6648_s3 + $0x30] sm:$0xff]  ;;  %vm543_vm2 = vcmask 64512  }
   0x5   :  { %5663 = vset.pattern.permute.xlu1 %v5774_v11  ;;  %5662 = vset.pattern.permute.xlu0 %v5774_v11  ;;  %v107_v15 = vld [vmem:[%s6648_s3 + $0x20] sm:$0xff]  ;;  %v110_v18 = vld [vmem:[%s6648_s3 + $0x38] sm:$0xff]  ;;  %v5873_v34 = vshrl.u32 %v67_v31, 7  ;;  %v92_v50 = vld [vmem:[%s6647_s2 + $0x68] sm:$0xff]  ;;  %vm3807_vm4 = vcmask 130048  }
   0x6   :  { %v5879_v36 = vld [vmem:[%s6651_s6] sm:$0xff]  ;;  %v80_v51 = vld [vmem:[%s6647_s2 + $0x8] sm:$0xff]  ;;  %v93_v52 = vld [vmem:[%s6647_s2 + $0x70] sm:$0xff] }
   0x7   :  { %51 = vadd.xlane.f32.xlu1 %v50_v6  ;;  %48 = vadd.xlane.f32.xlu0 %v47_v7  ;;  %v69_v35 = vsub.s32 0, %v5873_v34  ;;  %v75_v37 = vsub.s32 1, %v5873_v34  ;;  %v81_v53 = vld [vmem:[%s6647_s2 + $0x10] sm:$0xff]  ;;  %v94_v54 = vld [vmem:[%s6647_s2 + $0x78] sm:$0xff]  ;;  %v95_v56 = vld [vmem:[%s6647_s2 + $0x80] sm:$0xff] }
   0x8   :  { %v82_v55 = vld [vmem:[%s6647_s2 + $0x18] sm:$0xff]  ;;  %v83_v57 = vld [vmem:[%s6647_s2 + $0x20] sm:$0xff]  ;;  %v96_v58 = vld [vmem:[%s6647_s2 + $0x88] sm:$0xff] }
   0x9   :  { %v70_v39 = vrot.slane %v5879_v36, %v69_v35  ;;  %v76_v43 = vrot.slane %v5879_v36, %v75_v37  ;;  %v84_v59 = vld [vmem:[%s6647_s2 + $0x28] sm:$0xff]  ;;  %v97_v60 = vld [vmem:[%s6647_s2 + $0x90] sm:$0xff]  ;;  %v98_v62 = vld [vmem:[%s6647_s2 + $0x98] sm:$0xff] }
   0xa   :  { %v85_v61 = vld [vmem:[%s6647_s2 + $0x30] sm:$0xff]  ;;  %v86_v63 = vld [vmem:[%s6647_s2 + $0x38] sm:$0xff]  ;;  %v99_v3 = vld [vmem:[%s6647_s2 + $0xa0] sm:$0xff] }
   0xb   :  { %v87_v4 = vld [vmem:[%s6647_s2 + $0x40] sm:$0xff]  ;;  %v100_v5 = vld [vmem:[%s6647_s2 + $0xa8] sm:$0xff]  ;;  %v101_v7 = vld [vmem:[%s6647_s2 + $0xb0] sm:$0xff] }
   0xc   :  { %v88_v6 = vld [vmem:[%s6647_s2 + $0x48] sm:$0xff]  ;;  %v89_v8 = vld [vmem:[%s6647_s2 + $0x50] sm:$0xff]  ;;  %v102_v9 = vld [vmem:[%s6647_s2 + $0xb8] sm:$0xff] }
   0xd   :  { %vm6325_vm3 = vmpackc.low %vm35_vm0, %vm35_vm0 }
  0x18   :  { %130 = vperm.xlu1 %5663, %v104_v10   ;;  %v90_v10 = vld [vmem:[%s6647_s2 + $0x58] sm:$0xff] }
  0x1c   :  { %135 = vperm.xlu1 %5663, %v105_v13  }
  0x1d   :  { %125 = vperm.xlu0 %5662, %v103_v12  }
  0x20   :  { %140 = vperm.xlu1 %5663, %v106_v14  }
  0x24   :  { %145 = vperm.xlu1 %5663, %v107_v15  }
  0x28   :  { %150 = vperm.xlu1 %5663, %v108_v16  }
  0x2c   :  { %155 = vperm.xlu1 %5663, %v109_v17  }
  0x30   :  { %160 = vperm.xlu1 %5663, %v110_v18  }
  0x90   :  { %v41_v19 = vpop.xlane.xlu1 %40  ;;  %v38_v20 = vpop.xlane.xlu0 %37 }
  0x91   :  { %v44_v21 = vmul.f32 0.03125, %v41_v19  ;;  %v43_v22 = vmul.f32 0.03125, %v38_v20 }
  0x93   :  { %v56_v23 = vmul.f32 %v44_v21, %v44_v21  ;;  %v55_v26 = vmul.f32 %v43_v22, %v43_v22  ;;  %v64_v38 = vsub.f32 %v5824_v0, %v44_v21  ;;  %v63_v41 = vsub.f32 %v5829_v1, %v43_v22 }
  0x94   :  { %v52_v24 = vpop.xlane.xlu1 %51  ;;  %v49_v25 = vpop.xlane.xlu0 %48 }
  0x95   :  { %v54_v27 = vmul.f32 0.03125, %v52_v24  ;;  %v53_v28 = vmul.f32 0.03125, %v49_v25 }
  0x97   :  { %v58_v29 = vsub.f32 %v54_v27, %v56_v23  ;;  %v57_v30 = vsub.f32 %v53_v28, %v55_v26 }
  0x98   :  { %v131_v11 = vpop.permute.xlu1 %130 }
  0x99   :  { %v60_v32 = vadd.f32 1e-05, %v58_v29  ;;  %v59_v33 = vadd.f32 1e-05, %v57_v30 }
  0x9b   :  { %5664 = vrsqrt.f32 %v60_v32 }
  0x9c   :  { %5666 = vrsqrt.f32 %v59_v33  ;;  %v136_v12 = vpop.permute.xlu1 %135  ;;  %v126_v15 = vpop.permute.xlu0 %125 }
  0xa0   :  { %v141_v13 = vpop.permute.xlu1 %140 }
  0xa4   :  { %v5988_v18 = vpop.permute.xlu1 %145 }
  0xa5   :  { %v5665_v40 = vpop.eup %5664 }
  0xa6   :  { %v5667_v42 = vpop.eup %5666  ;;  %v66_v44 = vmul.f32 %v5665_v40, %v64_v38 }
  0xa7   :  { %v65_v45 = vmul.f32 %v5667_v42, %v63_v41 }
  0xa8   :  { %v72_v46 = vmul.f32 %v70_v39, %v66_v44  ;;  %v151_v28 = vpop.permute.xlu1 %150 }
  0xa9   :  { %v71_v47 = vmul.f32 %v70_v39, %v65_v45 }
  0xaa   :  { %v78_v48 = vadd.f32 %v76_v43, %v72_v46 }
  0xab   :  { %v77_v49 = vadd.f32 %v76_v43, %v71_v47 }
  0xac   :  { %5309 = vmatprep.subr.msk.mxu1 %vm35_vm0, %v78_v48 }
  0xad   :  { %5289 = vmatprep.subr.msk.mxu0 %vm35_vm0, %v77_v49  ;;  %5310 = vmatpush3.xpose.msk.msra.mxu1 %vm35_vm0, %v78_v48 }
  0xae   :  { %5290 = vmatpush3.xpose.msk.msra.mxu0 %vm35_vm0, %v77_v49  ;;  %5334 = vmatprep.subr.mxu1 %v5775_v2 }
  0xaf   :  { %5329 = vmatprep.subr.mxu0 %v5775_v2 }
  0xb0   :  { %5312 = vmatmul.mubr.msk.f32.vlgmr.msra.gmra.mrb[0].mxu1 %vm35_vm0, %v92_v50 }
  0xb1   :  { %5292 = vmatmul.mubr.msk.f32.vlgmr.msra.gmra.mrb[0].mxu0 %vm35_vm0, %v80_v51  ;;  %5314 = vmatprep.mubr.msk.f32.mxu1 %vm35_vm0, %v93_v52 }
  0xb2   :  { %5294 = vmatprep.mubr.msk.f32.mxu0 %vm35_vm0, %v81_v53 }
  0xb4   :  { %5315 = vmatmul.mubr.msk.f32.gmra.mrb[2].mxu1 %vm35_vm0, %v94_v54 }
  0xb5   :  { %5295 = vmatmul.mubr.msk.f32.gmra.mrb[2].mxu0 %vm35_vm0, %v82_v55  ;;  %5317 = vmatprep.mubr.msk.f32.mxu1 %vm35_vm0, %v95_v56  ;;  %v156_v55 = vpop.permute.xlu1 %155 }
  0xb6   :  { %5297 = vmatprep.mubr.msk.f32.mxu0 %vm35_vm0, %v83_v57 }
  0xb8   :  { %5318 = vmatmul.mubr.msk.f32.gmra.mrb[4].mxu1 %vm35_vm0, %v96_v58 }
  0xb9   :  { %5298 = vmatmul.mubr.msk.f32.gmra.mrb[4].mxu0 %vm35_vm0, %v84_v59  ;;  %5320 = vmatprep.mubr.msk.f32.mxu1 %vm35_vm0, %v97_v60  ;;  %v161_v56 = vpop.permute.xlu1 %160 }
  0xba   :  { %5300 = vmatprep.mubr.msk.f32.mxu0 %vm35_vm0, %v85_v61 }
  0xbc   :  { %5321 = vmatmul.mubr.msk.f32.gmra.mrb[6].mxu1 %vm35_vm0, %v98_v62 }
  0xbd   :  { %5301 = vmatmul.mubr.msk.f32.gmra.mrb[6].mxu0 %vm35_vm0, %v86_v63  ;;  %5323 = vmatprep.mubr.msk.f32.mxu1 %vm35_vm0, %v99_v3 }
  0xbe   :  { %5303 = vmatprep.mubr.msk.f32.mxu0 %vm35_vm0, %v87_v4 }
  0xc0   :  { %5324 = vmatmul.mubr.msk.f32.gmra.mrb[8].mxu1 %vm35_vm0, %v100_v5 }
  0xc1   :  { %5304 = vmatmul.mubr.msk.f32.gmra.mrb[8].mxu0 %vm35_vm0, %v88_v6  ;;  %5326 = vmatprep.mubr.msk.f32.mxu1 %vm35_vm0, %v101_v7 }
  0xc2   :  { %5306 = vmatprep.mubr.msk.f32.mxu0 %vm35_vm0, %v89_v8 }
  0xc4   :  { %5327 = vmatmul.mubr.msk.f32.gmra.mrb[10].mxu1 %vm35_vm0, %v102_v9 }
  0xc5   :  { %5307 = vmatmul.mubr.msk.f32.gmra.mrb[10].mxu0 %vm35_vm0, %v90_v10  ;;  %5336 = vmatprep.mubr.msk.f32.mxu1 %vm5776_vm1, %v5775_v2 }
  0xc6   :  { %5331 = vmatprep.mubr.msk.f32.mxu0 %vm5776_vm1, %v5775_v2 }
 0x183   :  { %v5313_v14 = vpop.f32.mrb[0].mxu1 }
 0x184   :  { %v5293_v16 = vpop.f32.mrb[0].mxu0  ;;  %v452_v17 = vpop.f32.mrb[1].mxu1  ;;  %v458_v27 = vadd.f32 %v5313_v14, %v131_v11 }
 0x185   :  { %v294_v19 = vadd.f32 %v5293_v16, %v131_v11  ;;  %v288_v20 = vpop.f32.mrb[1].mxu0  ;;  %v453_v44 = vadd.f32 %v452_v17, %v126_v15 }
 0x186   :  { %v289_v21 = vadd.f32 %v288_v20, %v126_v15 }
 0x187   :  { %617 = vxpose.xlu0.b32.start.end [1/1] (short) (narrow) %v294_v19, 8  ;;  %v5316_v22 = vpop.f32.mrb[2].mxu1 }
 0x188   :  { %v5296_v23 = vpop.f32.mrb[2].mxu0  ;;  %511 = vxpose.xlu1.b32.start.end [1/1] (short) (narrow) %v289_v21, 8  ;;  %v462_v24 = vpop.f32.mrb[3].mxu1  ;;  %v468_v39 = vadd.f32 %v5316_v22, %v141_v13 }
 0x189   :  { %v304_v25 = vadd.f32 %v5296_v23, %v141_v13  ;;  %v298_v26 = vpop.f32.mrb[3].mxu0  ;;  %v463_v46 = vadd.f32 %v462_v24, %v136_v12 }
 0x18a   :  { %v299_v32 = vadd.f32 %v298_v26, %v136_v12 }
 0x18b   :  { %827 = vxpose.xlu0.b32.start.end [1/1] (short) (narrow) %v304_v25, 8  ;;  %v5319_v29 = vpop.f32.mrb[4].mxu1 }
 0x18c   :  { %v5299_v30 = vpop.f32.mrb[4].mxu0  ;;  %1037 = vxpose.xlu1.b32.start.end [1/1] (short) (narrow) %v458_v27, 8  ;;  %v472_v31 = vpop.f32.mrb[5].mxu1  ;;  %v478_v61 = vadd.f32 %v5319_v29, %v151_v28 }
 0x18d   :  { %v314_v33 = vadd.f32 %v5299_v30, %v151_v28  ;;  %v308_v38 = vpop.f32.mrb[5].mxu0  ;;  %v473_v3 = vadd.f32 %v472_v31, %v5988_v18 }
 0x18e   :  { %v309_v40 = vadd.f32 %v308_v38, %v5988_v18  ;;  %v112_v38 = vld [vmem:[%s6648_s3 + $0x48] sm:$0xff] }
 0x18f   :  { %5335 = vmatpush3.msra.mxu1 %v314_v33  ;;  %722 = vxpose.xlu0.b32.start.end [1/1] (short) (narrow) %v299_v32, 8  ;;  %v5322_v41 = vpop.f32.mrb[6].mxu1 }
 0x190   :  { %v5302_v42 = vpop.f32.mrb[6].mxu0  ;;  %5330 = vmatpush3.msra.mxu0 %v309_v40  ;;  %1247 = vxpose.xlu1.b32.start.end [1/1] (short) (narrow) %v468_v39, 8  ;;  %v482_v43 = vpop.f32.mrb[7].mxu1  ;;  %v488_v4 = vadd.f32 %v5322_v41, %v161_v56  ;;  %v111_v39 = vld [vmem:[%s6648_s3 + $0x40] sm:$0xff] }
 0x191   :  { %v318_v45 = vpop.f32.mrb[7].mxu0  ;;  %5344 = vmatprep.subr.mxu1 %v5775_v2  ;;  %5339 = vmatprep.subr.mxu0 %v5775_v2  ;;  %v324_v57 = vadd.f32 %v5302_v42, %v161_v56  ;;  %v483_v7 = vadd.f32 %v482_v43, %v156_v55 }
 0x192   :  { %v319_v59 = vadd.f32 %v318_v45, %v156_v55 }
 0x193   :  { %932 = vxpose.xlu0.b32.start.end [1/1] (short) (narrow) %v453_v44, 8  ;;  %v5993_v47 = vpop.f32.mrb[8].mxu1 }
 0x194   :  { %v5995_v48 = vpop.f32.mrb[8].mxu0  ;;  %v5997_v49 = vpop.f32.mrb[9].mxu1 }
 0x195   :  { %v5999_v50 = vpop.f32.mrb[9].mxu0 }
 0x197   :  { %1142 = vxpose.xlu0.b32.start.end [1/1] (short) (narrow) %v463_v46, 8  ;;  %v6001_v51 = vpop.f32.mrb[10].mxu1 }
 0x198   :  { %v6003_v52 = vpop.f32.mrb[10].mxu0  ;;  %v6005_v53 = vpop.f32.mrb[11].mxu1 }
 0x199   :  { %v6007_v54 = vpop.f32.mrb[11].mxu0 }
 0x207   :  { %v633_v58 = vpop.trf.xlu0 }
 0x208   :  { %v527_v60 = vpop.trf.xlu1  ;;  %5337 = vmatmul.mubr.msk.f32.vlgmr.msra.gmra.mrb[12].mxu1 %vm543_vm2, %v633_v58 }
 0x209   :  { %5345 = vmatpush3.msra.mxu1 %v324_v57  ;;  %5332 = vmatmul.mubr.msk.f32.vlgmr.msra.gmra.mrb[12].mxu0 %vm543_vm2, %v527_v60 }
 0x20a   :  { %5340 = vmatpush3.msra.mxu0 %v319_v59  ;;  %5346 = vmatprep.mubr.msk.f32.mxu1 %vm5776_vm1, %v5775_v2 }
 0x20b   :  { %5354 = vmatprep.subr.mxu1 %v5775_v2  ;;  %v843_v62 = vpop.trf.xlu0  ;;  %5341 = vmatprep.mubr.msk.f32.mxu0 %vm5776_vm1, %v5775_v2 }
 0x20c   :  { %5347 = vmatmul.mubr.msk.f32.vlgmr.msra.gmra.mrb[14].mxu1 %vm543_vm2, %v843_v62  ;;  %5349 = vmatprep.subr.mxu0 %v5775_v2  ;;  %v1053_v63 = vpop.trf.xlu1 }
 0x20d   :  { %5355 = vmatpush3.msra.mxu1 %v478_v61  ;;  %5356 = vmatprep.mubr.msk.f32.mxu1 %vm5776_vm1, %v5775_v2 }
 0x20e   :  { %5364 = vmatprep.subr.mxu1 %v5775_v2 }
 0x20f   :  { %v738_v5 = vpop.trf.xlu0 }
 0x210   :  { %5342 = vmatmul.mubr.msk.f32.vlgmr.msra.gmra.mrb[14].mxu0 %vm543_vm2, %v738_v5  ;;  %5357 = vmatmul.mubr.msk.f32.vlgmr.msra.gmra.mrb[16].mxu1 %vm543_vm2, %v1053_v63  ;;  %v1263_v6 = vpop.trf.xlu1 }
 0x211   :  { %5350 = vmatpush3.msra.mxu0 %v473_v3  ;;  %5365 = vmatpush3.msra.mxu1 %v488_v4 }
 0x212   :  { %5351 = vmatprep.mubr.msk.f32.mxu0 %vm5776_vm1, %v5775_v2  ;;  %5359 = vmatprep.subr.mxu0 %v5775_v2 }
 0x213   :  { %v948_v8 = vpop.trf.xlu0  ;;  %5366 = vmatprep.mubr.msk.f32.mxu1 %vm5776_vm1, %v5775_v2  ;;  %5374 = vmatprep.subr.mxu1 %v5775_v2 }
 0x214   :  { %5352 = vmatmul.mubr.msk.f32.vlgmr.msra.gmra.mrb[16].mxu0 %vm543_vm2, %v948_v8  ;;  %5367 = vmatmul.mubr.msk.f32.vlgmr.msra.gmra.mrb[18].mxu1 %vm543_vm2, %v1263_v6 }
 0x215   :  { %5360 = vmatpush3.msra.mxu0 %v483_v7  ;;  %5361 = vmatprep.mubr.msk.f32.mxu0 %vm5776_vm1, %v5775_v2 }
 0x216   :  { %5369 = vmatprep.subr.mxu0 %v5775_v2  ;;  %5376 = vmatprep.mubr.msk.f32.mxu1 %vm5776_vm1, %v5775_v2 }
 0x217   :  { %v1158_v9 = vpop.trf.xlu0 }
 0x218   :  { %5362 = vmatmul.mubr.msk.f32.vlgmr.msra.gmra.mrb[18].mxu0 %vm543_vm2, %v1158_v9 }
 0x219   :  { %5371 = vmatprep.mubr.msk.f32.mxu0 %vm5776_vm1, %v5775_v2 }
 0x2db   :  { %v718_v10 = vpop.f32.mrb[12].mxu1 }
 0x2dc   :  { %v613_v11 = vpop.f32.mrb[12].mxu0  ;;  %v5338_v12 = vpop.f32.mrb[13].mxu1  ;;  %v1355_v13 = vsel %vm543_vm2, %v718_v10, -inf }
 0x2dd   :  { %v5333_v14 = vpop.f32.mrb[13].mxu0  ;;  %1356 = vmax.xlane.f32.xlu1 %v1355_v13  ;;  %v1352_v15 = vsel %vm543_vm2, %v613_v11, -inf }
 0x2de   :  { %1353 = vmax.xlane.f32.xlu0 %v1352_v15 }
 0x2df   :  { %v928_v16 = vpop.f32.mrb[14].mxu1 }
 0x2e0   :  { %v5348_v17 = vpop.f32.mrb[15].mxu1  ;;  %v1361_v18 = vsel %vm543_vm2, %v928_v16, -inf }
 0x2e1   :  { %1362 = vmax.xlane.f32.xlu1 %v1361_v18 }
 0x2e3   :  { %v823_v19 = vpop.f32.mrb[14].mxu0  ;;  %v1138_v20 = vpop.f32.mrb[16].mxu1 }
 0x2e4   :  { %v5343_v21 = vpop.f32.mrb[15].mxu0  ;;  %v1358_v22 = vsel %vm543_vm2, %v823_v19, -inf  ;;  %v5358_v23 = vpop.f32.mrb[17].mxu1  ;;  %v1367_v24 = vsel %vm543_vm2, %v1138_v20, -inf }
 0x2e5   :  { %1359 = vmax.xlane.f32.xlu1 %v1358_v22 }
 0x2e7   :  { %v1033_v25 = vpop.f32.mrb[16].mxu0  ;;  %v1348_v26 = vpop.f32.mrb[18].mxu1 }
 0x2e8   :  { %v5353_v27 = vpop.f32.mrb[17].mxu0  ;;  %v1364_v28 = vsel %vm543_vm2, %v1033_v25, -inf  ;;  %v5368_v29 = vpop.f32.mrb[19].mxu1  ;;  %v1373_v30 = vsel %vm543_vm2, %v1348_v26, -inf }
 0x2e9   :  { %1368 = vmax.xlane.f32.xlu1 %v1367_v24  ;;  %1365 = vmax.xlane.f32.xlu0 %v1364_v28  ;;  %v113_v27 = vld [vmem:[%s6648_s3 + $0x50] sm:$0xff]  ;;  %v114_v28 = vld [vmem:[%s6648_s3 + $0x58] sm:$0xff] }
 0x2eb   :  { %v1243_v31 = vpop.f32.mrb[18].mxu0 }
 0x2ec   :  { %v1370_v32 = vsel %vm543_vm2, %v1243_v31, -inf  ;;  %v5363_v33 = vpop.f32.mrb[19].mxu0 }
 0x2ed   :  { %1374 = vmax.xlane.f32.xlu1 %v1373_v30  ;;  %1371 = vmax.xlane.f32.xlu0 %v1370_v32 }
 0x2fe   :  { %170 = vperm.xlu1 %5663, %v112_v38  }
 0x303   :  { %165 = vperm.xlu0 %5662, %v111_v39  }
 0x36a   :  { %v1357_v40 = vpop.xlane.xlu1 %1356 }
 0x36b   :  { %v1377_v41 = vsub.f32 %v718_v10, %v1357_v40  ;;  %v1354_v42 = vpop.xlane.xlu0 %1353 }
 0x36c   :  { %v1376_v43 = vsub.f32 %v613_v11, %v1354_v42 }
 0x36d   :  { %v1386_v44 = vmul.f32 1.442695, %v1377_v41 }
 0x36e   :  { %v1384_v45 = vmul.f32 1.442695, %v1376_v43  ;;  %v1363_v46 = vpop.xlane.xlu1 %1362 }
 0x36f   :  { %5668 = vpow2.f32 %v1386_v44  ;;  %v1379_v55 = vsub.f32 %v928_v16, %v1363_v46 }
 0x370   :  { %5670 = vpow2.f32 %v1384_v45 }
 0x371   :  { %v1390_v56 = vmul.f32 1.442695, %v1379_v55 }
 0x372   :  { %v1360_v57 = vpop.xlane.xlu1 %1359 }
 0x373   :  { %5672 = vpow2.f32 %v1390_v56  ;;  %v1378_v58 = vsub.f32 %v823_v19, %v1360_v57 }
 0x375   :  { %v1388_v59 = vmul.f32 1.442695, %v1378_v58 }
 0x376   :  { %v1369_v60 = vpop.xlane.xlu1 %1368  ;;  %v1366_v61 = vpop.xlane.xlu0 %1365 }
 0x377   :  { %5674 = vpow2.f32 %v1388_v59  ;;  %v1381_v62 = vsub.f32 %v1138_v20, %v1369_v60  ;;  %v1380_v63 = vsub.f32 %v1033_v25, %v1366_v61 }
 0x379   :  { %v5669_v3 = vpop.eup %5668  ;;  %v1394_v4 = vmul.f32 1.442695, %v1381_v62  ;;  %v1392_v5 = vmul.f32 1.442695, %v1380_v63 }
 0x37a   :  { %v5671_v6 = vpop.eup %5670  ;;  %v1375_v7 = vpop.xlane.xlu1 %1374  ;;  %v1403_v9 = vsel %vm543_vm2, %v5669_v3, 0.0 }
 0x37b   :  { %v1372_v8 = vpop.xlane.xlu0 %1371  ;;  %5676 = vpow2.f32 %v1394_v4  ;;  %v1383_v10 = vsub.f32 %v1348_v26, %v1375_v7  ;;  %1404 = vadd.xlane.f32.xlu1 %v1403_v9  ;;  %v1400_v12 = vsel %vm543_vm2, %v5671_v6, 0.0 }
 0x37c   :  { %v1382_v11 = vsub.f32 %v1243_v31, %v1372_v8  ;;  %5678 = vpow2.f32 %v1392_v5  ;;  %1401 = vadd.xlane.f32.xlu0 %v1400_v12 }
 0x37d   :  { %v5673_v13 = vpop.eup %5672  ;;  %v1398_v14 = vmul.f32 1.442695, %v1383_v10  ;;  %v116_v10 = vld [vmem:[%s6649_s4 + $0x8] sm:$0xff] }
 0x37e   :  { %v1396_v15 = vmul.f32 1.442695, %v1382_v11  ;;  %v1409_v16 = vsel %vm543_vm2, %v5673_v13, 0.0  ;;  %v171_v29 = vpop.permute.xlu1 %170  ;;  %v5777_v11 = vmov 0.0|0.0  }
 0x37f   :  { %5680 = vpow2.f32 %v1398_v14  ;;  %1410 = vadd.xlane.f32.xlu1 %v1409_v16  ;;  %v334_v46 = vadd.f32 %v5995_v48, %v171_v29 }
 0x380   :  { %5682 = vpow2.f32 %v1396_v15 }
 0x381   :  { %v5675_v17 = vpop.eup %5674 }
 0x382   :  { %v1406_v18 = vsel %vm543_vm2, %v5675_v17, 0.0  ;;  %v166_v30 = vpop.permute.xlu0 %165 }
 0x383   :  { %1407 = vadd.xlane.f32.xlu0 %v1406_v18  ;;  %v329_v55 = vadd.f32 %v5999_v50, %v166_v30  ;;  %v493_v8 = vadd.f32 %v5997_v49, %v166_v30 }
 0x385   :  { %v5677_v19 = vpop.eup %5676 }
 0x386   :  { %v5679_v20 = vpop.eup %5678  ;;  %v1415_v21 = vsel %vm543_vm2, %v5677_v19, 0.0 }
 0x387   :  { %1416 = vadd.xlane.f32.xlu1 %v1415_v21  ;;  %v1412_v22 = vsel %vm543_vm2, %v5679_v20, 0.0  ;;  %v121_v21 = vld [vmem:[%s6649_s4 + $0x30] sm:$0xff] }
 0x388   :  { %1413 = vadd.xlane.f32.xlu0 %v1412_v22 }
 0x389   :  { %v6060_v23 = vpop.eup %5680 }
 0x38a   :  { %v6062_v24 = vpop.eup %5682  ;;  %v1421_v25 = vsel %vm543_vm2, %v6060_v23, 0.0 }
 0x38b   :  { %1422 = vadd.xlane.f32.xlu1 %v1421_v25  ;;  %v1418_v26 = vsel %vm543_vm2, %v6062_v24, 0.0 }
 0x38c   :  { %1419 = vadd.xlane.f32.xlu0 %v1418_v26 }
 0x39c   :  { %175 = vperm.xlu1 %5663, %v113_v27  }
 0x3a2   :  { %180 = vperm.xlu0 %5662, %v114_v28  }
 0x408   :  { %v1405_v31 = vpop.xlane.xlu1 %1404 }
 0x409   :  { %5684 = vrcp.f32 %v1405_v31  ;;  %v1402_v32 = vpop.xlane.xlu0 %1401 }
 0x40a   :  { %5686 = vrcp.f32 %v1402_v32 }
 0x40c   :  { %v1411_v33 = vpop.xlane.xlu1 %1410 }
 0x40d   :  { %5688 = vrcp.f32 %v1411_v33 }
 0x410   :  { %v1408_v38 = vpop.xlane.xlu0 %1407 }
 0x411   :  { %5690 = vrcp.f32 %v1408_v38 }
 0x413   :  { %v5685_v39 = vpop.eup %5684 }
 0x414   :  { %v5687_v40 = vpop.eup %5686  ;;  %v1433_v41 = vmul.f32 %v5685_v39, %v5669_v3  ;;  %v1417_v42 = vpop.xlane.xlu1 %1416 }
 0x415   :  { %v1432_v43 = vmul.f32 %v5687_v40, %v5671_v6  ;;  %5692 = vrcp.f32 %v1417_v42  ;;  %v1414_v44 = vpop.xlane.xlu0 %1413 }
 0x416   :  { %5694 = vrcp.f32 %v1414_v44  ;;  %5375 = vmatpush3.xpose.msk.msra.mxu1 %vm543_vm2, %v1433_v41  ;;  %v34_v44 = vld [vmem:[%s6651_s6 + $0x8] sm:$0x7f] }
 0x417   :  { %v5689_v45 = vpop.eup %5688  ;;  %5370 = vmatpush3.xpose.msk.msra.mxu0 %vm543_vm2, %v1432_v43  ;;  %5384 = vmatprep.subr.mxu1 %v5775_v2  ;;  %v2260_v43 = vsub.s32 3, %v5873_v34 }
 0x418   :  { %v1435_v56 = vmul.f32 %v5689_v45, %v5673_v13  ;;  %v1423_v57 = vpop.xlane.xlu1 %1422  ;;  %5379 = vmatprep.subr.mxu0 %v5775_v2  ;;  %v118_v13 = vld [vmem:[%s6649_s4 + $0x18] sm:$0xff] }
 0x419   :  { %5696 = vrcp.f32 %v1423_v57  ;;  %v1420_v58 = vpop.xlane.xlu0 %1419  ;;  %5377 = vmatmul.mubr.msk.f32.vlgmr.msra.gmra.mrb[20].mxu1 %vm543_vm2, %v334_v46  ;;  %v2261_v45 = vrot.slane %v34_v44, %v2260_v43  ;;  %v2267_v46 = vrot.slane %v34_v44, %v69_v35 }
 0x41a   :  { %5698 = vrcp.f32 %v1420_v58  ;;  %5372 = vmatmul.mubr.msk.f32.vlgmr.msra.gmra.mrb[20].mxu0 %vm543_vm2, %v329_v55  ;;  %5385 = vmatpush3.xpose.msk.msra.mxu1 %vm543_vm2, %v1435_v56 }
 0x41b   :  { %v5691_v48 = vpop.eup %5690  ;;  %5381 = vmatprep.mubr.msk.f32.mxu0 %vm5776_vm1, %v5775_v2  ;;  %5386 = vmatprep.mubr.msk.f32.mxu1 %vm5776_vm1, %v5775_v2 }
 0x41c   :  { %v1434_v50 = vmul.f32 %v5691_v48, %v5675_v17  ;;  %v176_v59 = vpop.permute.xlu1 %175  ;;  %5394 = vmatprep.subr.mxu1 %v5775_v2 }
 0x41d   :  { %v339_v61 = vadd.f32 %v6007_v54, %v176_v59  ;;  %v503_v49 = vadd.f32 %v6005_v53, %v176_v59  ;;  %v115_v53 = vld [vmem:[%s6649_s4] sm:$0xff] }
 0x41e   :  { %5380 = vmatpush3.xpose.msk.msra.mxu0 %vm543_vm2, %v1434_v50  ;;  %v5604_v12 = vpack.c.bf16 %v116_v10, %v115_v53  ;;  %v6204_v53 = vld [vmem:[%s6646_s1 + $0x18] sm:$0xff] }
 0x41f   :  { %v5693_v60 = vpop.eup %5692  ;;  %5389 = vmatprep.subr.mxu0 %v5775_v2 }
 0x420   :  { %v5695_v62 = vpop.eup %5694  ;;  %v1437_v63 = vmul.f32 %v5693_v60, %v5677_v19  ;;  %v119_v19 = vld [vmem:[%s6649_s4 + $0x20] sm:$0xff] }
 0x421   :  { %v1436_v3 = vmul.f32 %v5695_v62, %v5679_v20  ;;  %v181_v4 = vpop.permute.xlu0 %180  ;;  %5382 = vmatmul.mubr.msk.f32.vlgmr.msra.gmra.mrb[22].mxu0 %vm543_vm2, %v339_v61  ;;  %v120_v20 = vld [vmem:[%s6649_s4 + $0x28] sm:$0xff] }
 0x422   :  { %v344_v5 = vadd.f32 %v6003_v52, %v181_v4  ;;  %5391 = vmatprep.mubr.msk.f32.mxu0 %vm5776_vm1, %v5775_v2  ;;  %v498_v52 = vadd.f32 %v5993_v47, %v171_v29  ;;  %v508_v47 = vadd.f32 %v6001_v51, %v181_v4  ;;  %v117_v51 = vld [vmem:[%s6649_s4 + $0x10] sm:$0xff]  ;;  %v5610_v22 = vpack.c.bf16 %v120_v20, %v119_v19  ;;  %v5056_v20 = vld [vmem:[%s6648_s3 + $0x78] sm:$0xff] }
 0x423   :  { %v5697_v6 = vpop.eup %5696  ;;  %5390 = vmatpush3.xpose.msk.msra.mxu0 %vm543_vm2, %v1436_v3  ;;  %v5607_v14 = vpack.c.bf16 %v118_v13, %v117_v51  ;;  %v2333_v13 = vmul.f32 %v6204_v53, %v6204_v53  ;;  %v5055_v19 = vld [vmem:[%s6648_s3 + $0x70] sm:$0xff] }
 0x424   :  { %v5699_v7 = vpop.eup %5698  ;;  %5387 = vmatmul.mubr.msk.f32.vlgmr.msra.gmra.mrb[22].mxu1 %vm543_vm2, %v344_v5  ;;  %5399 = vmatprep.subr.mxu0 %v5775_v2  ;;  %v1439_v54 = vmul.f32 %v5697_v6, %v6060_v23  ;;  %v122_v23 = vld [vmem:[%s6649_s4 + $0x38] sm:$0xff]  ;;  %v6183_v6 = vld [vmem:[%s6646_s1 + $0x8] sm:$0xff] }
 0x425   :  { %v1438_v9 = vmul.f32 %v5699_v7, %v6062_v24  ;;  %5395 = vmatpush3.xpose.msk.msra.mxu1 %vm543_vm2, %v1437_v63  ;;  %5396 = vmatprep.mubr.msk.f32.mxu1 %vm5776_vm1, %v5775_v2  ;;  %v5613_v24 = vpack.c.bf16 %v122_v23, %v121_v21  ;;  %v5057_v21 = vld [vmem:[%s6648_s3 + $0x80] sm:$0xff]  ;;  %v5058_v23 = vld [vmem:[%s6648_s3 + $0x88] sm:$0xff] }
 0x426   :  { %5392 = vmatmul.mubr.msk.f32.vlgmr.msra.gmra.mrb[24].mxu0 %vm543_vm2, %v493_v8  ;;  %5404 = vmatprep.subr.mxu1 %v5775_v2 }
 0x427   :  { %5400 = vmatpush3.xpose.msk.msra.mxu0 %vm543_vm2, %v1438_v9  ;;  %5401 = vmatprep.mubr.msk.f32.mxu0 %vm5776_vm1, %v5775_v2  ;;  %v2331_v9 = vmul.f32 %v6183_v6, %v6183_v6 }
 0x428   :  { %5397 = vmatmul.mubr.msk.f32.vlgmr.msra.gmra.mrb[24].mxu1 %vm543_vm2, %v498_v52  ;;  %5603 = vmatprep.subr.bf16.mxu0 %v5777_v11 }
 0x429   :  { %5405 = vmatpush3.xpose.msk.msra.mxu1 %vm543_vm2, %v1439_v54  ;;  %5406 = vmatprep.mubr.msk.f32.mxu1 %vm5776_vm1, %v5775_v2  ;;  %v2317_v54 = vsel %vm35_vm0, %v6183_v6, 0.0 }
 0x42a   :  { %5402 = vmatmul.mubr.msk.f32.vlgmr.msra.gmra.mrb[26].mxu0 %vm543_vm2, %v503_v49  ;;  %5609 = vmatprep.subr.bf16.mxu1 %v5777_v11  ;;  %v6198_v49 = vld [vmem:[%s6646_s1 + $0x10] sm:$0xff] }
 0x42b   :  { %5417 = vmatprep.mubr.msk.f32.mxu0 %vm5776_vm1, %v5775_v2  ;;  %5605 = vmatpush3.bf16.msra.mxu0 %v5604_v12  ;;  %v2320_v10 = vsel %vm35_vm0, %v6198_v49, 0.0  ;;  %v2332_v51 = vmul.f32 %v6198_v49, %v6198_v49  ;;  %v2323_v12 = vsel %vm35_vm0, %v6204_v53, 0.0 }
 0x42c   :  { %5407 = vmatmul.mubr.msk.f32.vlgmr.msra.gmra.mrb[26].mxu1 %vm543_vm2, %v508_v47  ;;  %5606 = vmatprep.subr.bf16.mxu0 %v5777_v11  ;;  %v2337_v47 = vsel %vm35_vm0, %v2331_v9, 0.0 }
 0x42d   :  { %5428 = vmatprep.mubr.msk.f32.mxu1 %vm5776_vm1, %v5775_v2  ;;  %5611 = vmatpush3.bf16.msra.mxu1 %v5610_v22  ;;  %v5041_v22 = vld [vmem:[%s6647_s2 + $0x120] sm:$0xff] }
 0x42e   :  { %5612 = vmatprep.subr.bf16.mxu1 %v5777_v11 }
 0x42f   :  { %5608 = vmatpush3.bf16.msra.mxu0 %v5607_v14  ;;  %v2340_v14 = vsel %vm35_vm0, %v2332_v51, 0.0 }
 0x431   :  { %5614 = vmatpush3.bf16.msra.mxu1 %v5613_v24  ;;  %v5059_v24 = vld [vmem:[%s6648_s3 + $0x90] sm:$0xff] }
 0x4ec   :  { %v1588_v15 = vpop.f32.mrb[20].mxu1 }
 0x4ed   :  { %v1512_v16 = vpop.f32.mrb[20].mxu0  ;;  %v5378_v17 = vpop.f32.mrb[21].mxu1 }
 0x4ee   :  { %2048 = vxpose.xlu1.b32.start [1/4] (short) (narrow) %v1512_v16, 8  ;;  %v5373_v18 = vpop.f32.mrb[21].mxu0  ;;  %v5029_v16 = vld [vmem:[%s6647_s2 + $0xc0] sm:$0xff]  ;;  %v5054_v17 = vld [vmem:[%s6648_s3 + $0x68] sm:$0xff] }
 0x4ef   :  { %v5053_v18 = vld [vmem:[%s6648_s3 + $0x60] sm:$0xff] }
 0x4f2   :  { %2049 = vxpose.xlu1.b32.cont [2/4] (short) (narrow) %v1588_v15, 8  ;;  %v2343_v15 = vsel %vm35_vm0, %v2333_v13, 0.0  ;;  %v5030_v13 = vld [vmem:[%s6647_s2 + $0xc8] sm:$0xff] }
 0x4f4   :  { %v1664_v25 = vpop.f32.mrb[22].mxu0 }
 0x4f5   :  { %v5383_v26 = vpop.f32.mrb[23].mxu0 }
 0x4f6   :  { %2050 = vxpose.xlu1.b32.cont [3/4] (short) (narrow) %v1664_v25, 8  ;;  %v5060_v25 = vld [vmem:[%s6648_s3 + $0x98] sm:$0xff] }
 0x4f7   :  { %v1740_v27 = vpop.f32.mrb[22].mxu1 }
 0x4f8   :  { %v5388_v28 = vpop.f32.mrb[23].mxu1 }
 0x4f9   :  { %v1816_v29 = vpop.f32.mrb[24].mxu0 }
 0x4fa   :  { %2153 = vxpose.xlu0.b32.start [1/4] (short) (narrow) %v1816_v29, 8  ;;  %v5393_v30 = vpop.f32.mrb[25].mxu0  ;;  %2051 = vxpose.xlu1.b32.end [4/4] (short) (narrow) %v1740_v27, 8 }
 0x4fb   :  { %v1892_v31 = vpop.f32.mrb[24].mxu1 }
 0x4fc   :  { %v5398_v32 = vpop.f32.mrb[25].mxu1 }
 0x4fd   :  { %v1968_v33 = vpop.f32.mrb[26].mxu0 }
 0x4fe   :  { %v5403_v38 = vpop.f32.mrb[27].mxu0  ;;  %2154 = vxpose.xlu0.b32.cont [2/4] (short) (narrow) %v1892_v31, 8 }
 0x4ff   :  { %v2044_v39 = vpop.f32.mrb[26].mxu1 }
 0x500   :  { %v5408_v40 = vpop.f32.mrb[27].mxu1 }
 0x501   :  { %v2304_v40 = vsub.s32 2, %v5873_v34 }
 0x502   :  { %2155 = vxpose.xlu0.b32.cont [3/4] (short) (narrow) %v1968_v33, 8 }
 0x506   :  { %2156 = vxpose.xlu0.b32.end [4/4] (short) (narrow) %v2044_v39, 8 }
 0x56e   :  { %v2064_v41 = vpop.trf.xlu1 }
 0x56f   :  { %5418 = vmatmul.mubr.msk.f32.vlgmr.msra.gmra.mrb[28].mxu0 %vm35_vm0, %v2064_v41 }
 0x570   :  { %5433 = vmatprep.mubr.msk.f32.mxu0 %vm35_vm0, %v5029_v16 }
 0x57a   :  { %v2169_v42 = vpop.trf.xlu0 }
 0x57b   :  { %5429 = vmatmul.mubr.msk.f32.vlgmr.msra.gmra.mrb[28].mxu1 %vm35_vm0, %v2169_v42 }
 0x57c   :  { %5441 = vmatprep.mubr.msk.f32.mxu1 %vm35_vm0, %v5041_v22 }
 0x642   :  { %v2149_v55 = vpop.f32.mrb[28].mxu0 }
 0x643   :  { %v2262_v56 = vadd.f32 %v2261_v45, %v2149_v55  ;;  %v5419_v57 = vpop.f32.mrb[29].mxu0 }
 0x644   :  { %v2305_v57 = vrot.slane %v5879_v36, %v2304_v40 }
 0x645   :  { %v2268_v58 = vmul.f32 %v2267_v46, %v2262_v56 }
 0x647   :  { %v6161_v48 = vadd.f32 %v2268_v58, %v5829_v1  ;;  %v6174_v1 = vld [vmem:[%s6646_s1] sm:$0xff] }
 0x648   :  { %v2314_v7 = vsel %vm35_vm0, %v6174_v1, 0.0  ;;  %v2330_v8 = vmul.f32 %v6174_v1, %v6174_v1 }
 0x649   :  { %v2272_v50 = vsel %vm35_vm0, %v6161_v48, 0.0  ;;  %v2280_v59 = vmul.f32 %v6161_v48, %v6161_v48 }
 0x64a   :  { %2273 = vadd.xlane.f32.xlu0 %v2272_v50  ;;  %v2334_v52 = vsel %vm35_vm0, %v2330_v8, 0.0 }
 0x64b   :  { %v2282_v60 = vsel %vm35_vm0, %v2280_v59, 0.0 }
 0x64c   :  { %2283 = vadd.xlane.f32.xlu1 %v2282_v60 }
 0x64e   :  { %v2254_v61 = vpop.f32.mrb[28].mxu1 }
 0x64f   :  { %v2263_v62 = vadd.f32 %v2261_v45, %v2254_v61  ;;  %v5430_v35 = vpop.f32.mrb[29].mxu1  ;;  %v2311_v61 = vrot.slane %v5879_v36, %v2260_v43 }
 0x651   :  { %v2269_v63 = vmul.f32 %v2267_v46, %v2263_v62 }
 0x653   :  { %v6169_v3 = vadd.f32 %v2269_v63, %v5824_v0 }
 0x655   :  { %v2275_v4 = vsel %vm35_vm0, %v6169_v3, 0.0  ;;  %v2281_v5 = vmul.f32 %v6169_v3, %v6169_v3 }
 0x656   :  { %2276 = vadd.xlane.f32.xlu0 %v2275_v4 }
 0x657   :  { %v2285_v0 = vsel %vm35_vm0, %v2281_v5, 0.0 }
 0x658   :  { %2286 = vadd.xlane.f32.xlu1 %v2285_v0 }
 0x65a   :  { %2315 = vadd.xlane.f32.xlu0 %v2314_v7 }
 0x65c   :  { %2318 = vadd.xlane.f32.xlu1 %v2317_v54 }
 0x65e   :  { %2335 = vadd.xlane.f32.xlu0 %v2334_v52 }
 0x660   :  { %2338 = vadd.xlane.f32.xlu1 %v2337_v47 }
 0x662   :  { %2321 = vadd.xlane.f32.xlu0 %v2320_v10 }
 0x664   :  { %2324 = vadd.xlane.f32.xlu1 %v2323_v12 }
 0x666   :  { %2341 = vadd.xlane.f32.xlu0 %v2340_v14 }
 0x668   :  { %2344 = vadd.xlane.f32.xlu1 %v2343_v15  ;;  %v5031_v15 = vld [vmem:[%s6647_s2 + $0xd0] sm:$0xff] }
 0x679   :  { %2444 = vperm.xlu1 %5663, %v5054_v17  }
 0x67c   :  { %2439 = vperm.xlu0 %5662, %v5053_v18  }
 0x67d   :  { %2449 = vperm.xlu1 %5663, %v5055_v19  }
 0x680   :  { %2454 = vperm.xlu0 %5662, %v5056_v20  }
 0x681   :  { %2659 = vperm.xlu1 %5663, %v5057_v21  }
 0x684   :  { %2664 = vperm.xlu0 %5662, %v5058_v23   ;;  %v5032_v23 = vld [vmem:[%s6647_s2 + $0xd8] sm:$0xff] }
 0x685   :  { %2669 = vperm.xlu1 %5663, %v5059_v24  }
 0x688   :  { %2674 = vperm.xlu0 %5662, %v5060_v25   ;;  %v2376_v25 = vsub.s32 4, %v5873_v34 }
 0x6d7   :  { %v2274_v26 = vpop.xlane.xlu0 %2273 }
 0x6d8   :  { %v2278_v27 = vmul.f32 0.03125, %v2274_v26  ;;  %v5033_v26 = vld [vmem:[%s6647_s2 + $0xe0] sm:$0xff] }
 0x6d9   :  { %v2284_v28 = vpop.xlane.xlu1 %2283 }
 0x6da   :  { %v2290_v29 = vmul.f32 %v2278_v27, %v2278_v27  ;;  %v2288_v30 = vmul.f32 0.03125, %v2284_v28  ;;  %v2298_v55 = vsub.f32 %v6161_v48, %v2278_v27 }
 0x6dc   :  { %v2292_v31 = vsub.f32 %v2288_v30, %v2290_v29 }
 0x6de   :  { %v2294_v32 = vadd.f32 1e-05, %v2292_v31  ;;  %v2384_v31 = vsub.s32 5, %v5873_v34 }
 0x6e0   :  { %5700 = vrsqrt.f32 %v2294_v32 }
 0x6e3   :  { %v2277_v33 = vpop.xlane.xlu0 %2276 }
 0x6e4   :  { %v2279_v38 = vmul.f32 0.03125, %v2277_v33 }
 0x6e5   :  { %v2287_v39 = vpop.xlane.xlu1 %2286 }
 0x6e6   :  { %v2291_v41 = vmul.f32 %v2279_v38, %v2279_v38  ;;  %v2289_v42 = vmul.f32 0.03125, %v2287_v39  ;;  %v2299_v18 = vsub.f32 %v6169_v3, %v2279_v38  ;;  %v6296_v39 = vld [vmem:[%s6651_s6] sm:$0xff] }
 0x6e7   :  { %v2316_v44 = vpop.xlane.xlu0 %2315 }
 0x6e8   :  { %v2293_v45 = vsub.f32 %v2289_v42, %v2291_v41  ;;  %v6249_v46 = vmul.f32 0.03125, %v2316_v44  ;;  %v2385_v44 = vrot.slane %v6296_v39, %v2384_v31 }
 0x6e9   :  { %v2319_v56 = vpop.xlane.xlu1 %2318 }
 0x6ea   :  { %v5701_v58 = vpop.eup %5700  ;;  %v2295_v50 = vadd.f32 1e-05, %v2293_v45  ;;  %v6255_v59 = vmul.f32 0.03125, %v2319_v56  ;;  %v2350_v60 = vmul.f32 %v6249_v46, %v6249_v46  ;;  %v2366_v29 = vsub.f32 %v6174_v1, %v6249_v46  ;;  %v5042_v45 = vld [vmem:[%s6647_s2 + $0x128] sm:$0xff]  ;;  %v5043_v46 = vld [vmem:[%s6647_s2 + $0x130] sm:$0xff] }
 0x6eb   :  { %v2336_v62 = vpop.xlane.xlu0 %2335  ;;  %v2300_v35 = vmul.f32 %v5701_v58, %v2298_v55  ;;  %v2377_v1 = vrot.slane %v6296_v39, %v2376_v25 }
 0x6ec   :  { %5702 = vrsqrt.f32 %v2295_v50  ;;  %v2351_v63 = vmul.f32 %v6255_v59, %v6255_v59  ;;  %v2346_v4 = vmul.f32 0.03125, %v2336_v62  ;;  %v2367_v33 = vsub.f32 %v6183_v6, %v6255_v59  ;;  %v5044_v59 = vld [vmem:[%s6647_s2 + $0x138] sm:$0xff]  ;;  %v5045_v62 = vld [vmem:[%s6647_s2 + $0x140] sm:$0xff] }
 0x6ed   :  { %v2339_v5 = vpop.xlane.xlu1 %2338  ;;  %v2306_v0 = vmul.f32 %v2305_v57, %v2300_v35 }
 0x6ee   :  { %v2347_v7 = vmul.f32 0.03125, %v2339_v5  ;;  %v2354_v8 = vsub.f32 %v2346_v4, %v2350_v60 }
 0x6ef   :  { %v2322_v54 = vpop.xlane.xlu0 %2321  ;;  %v2312_v9 = vadd.f32 %v2311_v61, %v2306_v0 }
 0x6f0   :  { %v2355_v52 = vsub.f32 %v2347_v7, %v2351_v63  ;;  %v2358_v47 = vadd.f32 1e-05, %v2354_v8  ;;  %v6264_v10 = vmul.f32 0.03125, %v2322_v54 }
 0x6f1   :  { %v2325_v51 = vpop.xlane.xlu1 %2324  ;;  %5431 = vmatprep.subr.msk.mxu0 %vm35_vm0, %v2312_v9 }
 0x6f2   :  { %v2359_v36 = vadd.f32 1e-05, %v2355_v52  ;;  %5704 = vrsqrt.f32 %v2358_v47  ;;  %v2329_v43 = vmul.f32 0.03125, %v2325_v51  ;;  %v2352_v12 = vmul.f32 %v6264_v10, %v6264_v10  ;;  %5432 = vmatpush3.xpose.msk.msra.mxu0 %vm35_vm0, %v2312_v9  ;;  %v5034_v9 = vld [vmem:[%s6647_s2 + $0xe8] sm:$0xff]  ;;  %v5035_v47 = vld [vmem:[%s6647_s2 + $0xf0] sm:$0xff] }
 0x6f3   :  { %v2342_v14 = vpop.xlane.xlu0 %2341  ;;  %v5046_v51 = vld [vmem:[%s6647_s2 + $0x148] sm:$0xff] }
 0x6f4   :  { %5706 = vrsqrt.f32 %v2359_v36  ;;  %v2353_v16 = vmul.f32 %v2329_v43, %v2329_v43  ;;  %v2348_v17 = vmul.f32 0.03125, %v2342_v14  ;;  %v2369_v60 = vsub.f32 %v6204_v53, %v2329_v43  ;;  %v5047_v36 = vld [vmem:[%s6647_s2 + $0x150] sm:$0xff]  ;;  %v5048_v43 = vld [vmem:[%s6647_s2 + $0x158] sm:$0xff]  ;;  %v5037_v14 = vld [vmem:[%s6647_s2 + $0x100] sm:$0xff] }
 0x6f5   :  { %v2345_v19 = vpop.xlane.xlu1 %2344  ;;  %5434 = vmatmul.mubr.msk.f32.vlgmr.msra.gmra.mrb[30].mxu0 %vm35_vm0, %v5030_v13  ;;  %v5050_v13 = vld [vmem:[%s6647_s2 + $0x168] sm:$0xff] }
 0x6f6   :  { %v5703_v20 = vpop.eup %5702  ;;  %v2349_v21 = vmul.f32 0.03125, %v2345_v19  ;;  %v2356_v22 = vsub.f32 %v2348_v17, %v2352_v12  ;;  %5436 = vmatprep.mubr.msk.f32.mxu0 %vm35_vm0, %v5031_v15  ;;  %v5049_v12 = vld [vmem:[%s6647_s2 + $0x160] sm:$0xff]  ;;  %v5038_v15 = vld [vmem:[%s6647_s2 + $0x108] sm:$0xff]  ;;  %v5039_v17 = vld [vmem:[%s6647_s2 + $0x110] sm:$0xff] }
 0x6f7   :  { %v2301_v24 = vmul.f32 %v5703_v20, %v2299_v18  ;;  %v5052_v18 = vld [vmem:[%s6647_s2 + $0x178] sm:$0xff] }
 0x6f8   :  { %v2357_v27 = vsub.f32 %v2349_v21, %v2353_v16  ;;  %v2360_v28 = vadd.f32 1e-05, %v2356_v22  ;;  %v5051_v16 = vld [vmem:[%s6647_s2 + $0x170] sm:$0xff]  ;;  %v5040_v19 = vld [vmem:[%s6647_s2 + $0x118] sm:$0xff] }
 0x6f9   :  { %5437 = vmatmul.mubr.msk.f32.gmra.mrb[32].mxu0 %vm35_vm0, %v5032_v23  ;;  %v2307_v30 = vmul.f32 %v2305_v57, %v2301_v24  ;;  %v2368_v57 = vsub.f32 %v6198_v49, %v6264_v10  ;;  %v5036_v10 = vld [vmem:[%s6647_s2 + $0xf8] sm:$0xff]  ;;  %v2445_v21 = vpop.permute.xlu1 %2444 }
 0x6fa   :  { %v2361_v32 = vadd.f32 1e-05, %v2357_v27  ;;  %5708 = vrsqrt.f32 %v2360_v28  ;;  %5451 = vmatprep.mubr.msk.f32.mxu0 %vm35_vm0, %v5033_v26 }
 0x6fb   :  { %v2313_v38 = vadd.f32 %v2311_v61, %v2307_v30  ;;  %v2440_v20 = vpop.permute.xlu0 %2439 }
 0x6fc   :  { %v5705_v41 = vpop.eup %5704  ;;  %5710 = vrsqrt.f32 %v2361_v32 }
 0x6fd   :  { %5439 = vmatprep.subr.msk.mxu1 %vm35_vm0, %v2313_v38  ;;  %v2370_v42 = vmul.f32 %v5705_v41, %v2366_v29  ;;  %v2450_v32 = vpop.permute.xlu1 %2449 }
 0x6fe   :  { %v5707_v6 = vpop.eup %5706  ;;  %5440 = vmatpush3.xpose.msk.msra.mxu1 %vm35_vm0, %v2313_v38 }
 0x6ff   :  { %v2371_v55 = vmul.f32 %v5707_v6, %v2367_v33  ;;  %v2378_v56 = vmul.f32 %v2377_v1, %v2370_v42  ;;  %v2455_v27 = vpop.permute.xlu0 %2454 }
 0x701   :  { %5442 = vmatmul.mubr.msk.f32.vlgmr.msra.gmra.mrb[30].mxu1 %vm35_vm0, %v5042_v45  ;;  %v2379_v58 = vmul.f32 %v2377_v1, %v2371_v55  ;;  %v2386_v50 = vadd.f32 %v2385_v44, %v2378_v56 }
 0x702   :  { %5444 = vmatprep.mubr.msk.f32.mxu1 %vm35_vm0, %v5043_v46 }
 0x703   :  { %v2387_v61 = vadd.f32 %v2385_v44, %v2379_v58  ;;  %v2665_v55 = vpop.permute.xlu0 %2664 }
 0x704   :  { %v5709_v35 = vpop.eup %5708 }
 0x705   :  { %5445 = vmatmul.mubr.msk.f32.gmra.mrb[32].mxu1 %vm35_vm0, %v5044_v59  ;;  %v5615_v63 = vpack.c.bf16 %v2387_v61, %v2386_v50  ;;  %v2372_v4 = vmul.f32 %v5709_v35, %v2368_v57  ;;  %v2660_v57 = vpop.permute.xlu1 %2659 }
 0x706   :  { %v5711_v5 = vpop.eup %5710  ;;  %5467 = vmatprep.mubr.msk.f32.mxu1 %vm35_vm0, %v5045_v62 }
 0x707   :  { %5617 = vmatprep.subr.msk.bf16.mxu0 %vm6325_vm3, %v5615_v63  ;;  %v2373_v53 = vmul.f32 %v5711_v5, %v2369_v60  ;;  %v2380_v0 = vmul.f32 %v2377_v1, %v2372_v4 }
 0x708   :  { %5620 = vmatpush3.bf16.xpose.msk.msra.mxu0 %vm6325_vm3, %v5615_v63 }
 0x709   :  { %v2381_v7 = vmul.f32 %v2377_v1, %v2373_v53  ;;  %v2388_v8 = vadd.f32 %v2385_v44, %v2380_v0  ;;  %5479 = vmatprep.subr.mxu0 %v5775_v2 }
 0x70b   :  { %v2389_v54 = vadd.f32 %v2385_v44, %v2381_v7  ;;  %v2675_v7 = vpop.permute.xlu0 %2674 }
 0x70d   :  { %v5621_v52 = vpack.c.bf16 %v2389_v54, %v2388_v8  ;;  %v2670_v8 = vpop.permute.xlu1 %2669 }
 0x70f   :  { %5452 = vmatmul.mubr.msk.f32.vlgmr.msra.gmra.mrb[34].mxu0 %vm35_vm0, %v5034_v9  ;;  %5623 = vmatprep.subr.msk.bf16.mxu1 %vm6325_vm3, %v5621_v52 }
 0x710   :  { %5626 = vmatpush3.bf16.xpose.msk.msra.mxu1 %vm6325_vm3, %v5621_v52  ;;  %5454 = vmatprep.mubr.msk.f32.mxu0 %vm35_vm0, %v5035_v47 }
 0x711   :  { %5484 = vmatprep.subr.mxu1 %v5775_v2 }
 0x713   :  { %5455 = vmatmul.mubr.msk.f32.gmra.mrb[36].mxu0 %vm35_vm0, %v5036_v10 }
 0x714   :  { %5457 = vmatprep.mubr.msk.f32.mxu0 %vm35_vm0, %v5037_v14 }
 0x717   :  { %5468 = vmatmul.mubr.msk.f32.vlgmr.msra.gmra.mrb[34].mxu1 %vm35_vm0, %v5046_v51  ;;  %5458 = vmatmul.mubr.msk.f32.gmra.mrb[38].mxu0 %vm35_vm0, %v5038_v15 }
 0x718   :  { %5470 = vmatprep.mubr.msk.f32.mxu1 %vm35_vm0, %v5047_v36  ;;  %5460 = vmatprep.mubr.msk.f32.mxu0 %vm35_vm0, %v5039_v17 }
 0x71b   :  { %5471 = vmatmul.mubr.msk.f32.gmra.mrb[36].mxu1 %vm35_vm0, %v5048_v43  ;;  %5461 = vmatmul.mubr.msk.f32.gmra.mrb[40].mxu0 %vm35_vm0, %v5040_v19 }
 0x71c   :  { %5473 = vmatprep.mubr.msk.f32.mxu1 %vm35_vm0, %v5049_v12  ;;  %5481 = vmatprep.mubr.msk.f32.mxu0 %vm5776_vm1, %v5775_v2 }
 0x71f   :  { %5474 = vmatmul.mubr.msk.f32.gmra.mrb[38].mxu1 %vm35_vm0, %v5050_v13 }
 0x720   :  { %5476 = vmatprep.mubr.msk.f32.mxu1 %vm35_vm0, %v5051_v16 }
 0x723   :  { %5477 = vmatmul.mubr.msk.f32.gmra.mrb[40].mxu1 %vm35_vm0, %v5052_v18 }
 0x724   :  { %5486 = vmatprep.mubr.msk.f32.mxu1 %vm5776_vm1, %v5775_v2 }
 0x7c8   :  { %v5435_v22 = vpop.f32.mrb[30].mxu0 }
 0x7c9   :  { %v2544_v23 = vadd.f32 %v5435_v22, %v2445_v21  ;;  %v2538_v24 = vpop.f32.mrb[31].mxu0 }
 0x7ca   :  { %v2539_v26 = vadd.f32 %v2538_v24, %v2440_v20 }
 0x7cb   :  { %3072 = vxpose.xlu0.b32.start.end [1/1] (short) (narrow) %v2544_v23, 8 }
 0x7cc   :  { %v5438_v28 = vpop.f32.mrb[32].mxu0  ;;  %2967 = vxpose.xlu1.b32.start.end [1/1] (short) (narrow) %v2539_v26, 8 }
 0x7cd   :  { %v2554_v29 = vadd.f32 %v5438_v28, %v2455_v27  ;;  %v2548_v30 = vpop.f32.mrb[33].mxu0 }
 0x7ce   :  { %v2549_v33 = vadd.f32 %v2548_v30, %v2450_v32 }
 0x7cf   :  { %3282 = vxpose.xlu0.b32.start.end [1/1] (short) (narrow) %v2554_v29, 8 }
 0x7d3   :  { %3177 = vxpose.xlu0.b32.start.end [1/1] (short) (narrow) %v2549_v33, 8 }
 0x7d4   :  { %v5443_v38 = vpop.f32.mrb[30].mxu1 }
 0x7d5   :  { %v2644_v1 = vadd.f32 %v5443_v38, %v2445_v21  ;;  %v2638_v41 = vpop.f32.mrb[31].mxu1 }
 0x7d6   :  { %v2639_v42 = vadd.f32 %v2638_v41, %v2440_v20 }
 0x7d7   :  { %3492 = vxpose.xlu1.b32.start.end [1/1] (short) (narrow) %v2644_v1, 8 }
 0x7d8   :  { %v5446_v44 = vpop.f32.mrb[32].mxu1  ;;  %3387 = vxpose.xlu0.b32.start.end [1/1] (short) (narrow) %v2639_v42, 8 }
 0x7d9   :  { %v2654_v6 = vadd.f32 %v5446_v44, %v2455_v27  ;;  %v2648_v45 = vpop.f32.mrb[33].mxu1 }
 0x7da   :  { %v2649_v46 = vadd.f32 %v2648_v45, %v2450_v32 }
 0x7db   :  { %3702 = vxpose.xlu1.b32.start.end [1/1] (short) (narrow) %v2654_v6, 8 }
 0x7dc   :  { %3597 = vxpose.xlu0.b32.start.end [1/1] (short) (narrow) %v2649_v46, 8 }
 0x7e2   :  { %v5453_v56 = vpop.f32.mrb[34].mxu0 }
 0x7e3   :  { %v2799_v58 = vadd.f32 %v5453_v56, %v2665_v55  ;;  %v2793_v50 = vpop.f32.mrb[35].mxu0 }
 0x7e4   :  { %v2794_v59 = vadd.f32 %v2793_v50, %v2660_v57 }
 0x7e5   :  { %5485 = vmatpush3.msra.mxu1 %v2799_v58 }
 0x7e6   :  { %v5456_v60 = vpop.f32.mrb[36].mxu0  ;;  %5480 = vmatpush3.msra.mxu0 %v2794_v59  ;;  %5494 = vmatprep.subr.mxu1 %v5775_v2 }
 0x7e7   :  { %v2803_v61 = vpop.f32.mrb[37].mxu0  ;;  %5489 = vmatprep.subr.mxu0 %v5775_v2  ;;  %v2809_v10 = vadd.f32 %v5456_v60, %v2675_v7  ;;  %v5062_v60 = vld [vmem:[%s6648_s3 + $0xa8] sm:$0xff] }
 0x7e8   :  { %v2804_v36 = vadd.f32 %v2803_v61, %v2670_v8  ;;  %v5061_v61 = vld [vmem:[%s6648_s3 + $0xa0] sm:$0xff] }
 0x7ea   :  { %v5469_v62 = vpop.f32.mrb[34].mxu1  ;;  %v6405_v5 = vpop.f32.mrb[38].mxu0 }
 0x7eb   :  { %v2928_v35 = vpop.f32.mrb[35].mxu1  ;;  %v6409_v0 = vpop.f32.mrb[39].mxu0  ;;  %v2934_v12 = vadd.f32 %v5469_v62, %v2665_v55 }
 0x7ec   :  { %v2929_v14 = vadd.f32 %v2928_v35, %v2660_v57 }
 0x7ee   :  { %v5472_v49 = vpop.f32.mrb[36].mxu1  ;;  %v6413_v9 = vpop.f32.mrb[40].mxu0 }
 0x7ef   :  { %v2938_v63 = vpop.f32.mrb[37].mxu1  ;;  %v6417_v47 = vpop.f32.mrb[41].mxu0  ;;  %v2944_v16 = vadd.f32 %v5472_v49, %v2675_v7 }
 0x7f0   :  { %v2939_v18 = vadd.f32 %v2938_v63, %v2670_v8 }
 0x7f2   :  { %v6403_v4 = vpop.f32.mrb[38].mxu1 }
 0x7f3   :  { %v6407_v53 = vpop.f32.mrb[39].mxu1 }
 0x7f6   :  { %v6411_v54 = vpop.f32.mrb[40].mxu1 }
 0x7f7   :  { %v6415_v52 = vpop.f32.mrb[41].mxu1 }
 0x84b   :  { %v3088_v51 = vpop.trf.xlu0 }
 0x84c   :  { %v2983_v43 = vpop.trf.xlu1  ;;  %5487 = vmatmul.mubr.msk.f32.vlgmr.msra.gmra.mrb[42].mxu1 %vm543_vm2, %v3088_v51 }
 0x84d   :  { %5495 = vmatpush3.msra.mxu1 %v2809_v10  ;;  %5482 = vmatmul.mubr.msk.f32.vlgmr.msra.gmra.mrb[42].mxu0 %vm543_vm2, %v2983_v43 }
 0x84e   :  { %5490 = vmatpush3.msra.mxu0 %v2804_v36  ;;  %5496 = vmatprep.mubr.msk.f32.mxu1 %vm5776_vm1, %v5775_v2 }
 0x84f   :  { %5504 = vmatprep.subr.mxu1 %v5775_v2  ;;  %v3298_v13 = vpop.trf.xlu0  ;;  %5491 = vmatprep.mubr.msk.f32.mxu0 %vm5776_vm1, %v5775_v2 }
 0x850   :  { %5497 = vmatmul.mubr.msk.f32.vlgmr.msra.gmra.mrb[44].mxu1 %vm543_vm2, %v3298_v13  ;;  %5499 = vmatprep.subr.mxu0 %v5775_v2 }
 0x851   :  { %5505 = vmatpush3.msra.mxu1 %v2934_v12  ;;  %5506 = vmatprep.mubr.msk.f32.mxu1 %vm5776_vm1, %v5775_v2 }
 0x852   :  { %5514 = vmatprep.subr.mxu1 %v5775_v2 }
 0x853   :  { %v3193_v15 = vpop.trf.xlu0 }
 0x854   :  { %5492 = vmatmul.mubr.msk.f32.vlgmr.msra.gmra.mrb[44].mxu0 %vm543_vm2, %v3193_v15 }
 0x855   :  { %5500 = vmatpush3.msra.mxu0 %v2929_v14  ;;  %5501 = vmatprep.mubr.msk.f32.mxu0 %vm5776_vm1, %v5775_v2 }
 0x856   :  { %5509 = vmatprep.subr.mxu0 %v5775_v2 }
 0x857   :  { %v3508_v17 = vpop.trf.xlu1 }
 0x858   :  { %5507 = vmatmul.mubr.msk.f32.vlgmr.msra.gmra.mrb[46].mxu1 %vm543_vm2, %v3508_v17  ;;  %v3403_v19 = vpop.trf.xlu0 }
 0x859   :  { %5515 = vmatpush3.msra.mxu1 %v2944_v16  ;;  %5502 = vmatmul.mubr.msk.f32.vlgmr.msra.gmra.mrb[46].mxu0 %vm543_vm2, %v3403_v19 }
 0x85a   :  { %5510 = vmatpush3.msra.mxu0 %v2939_v18  ;;  %5511 = vmatprep.mubr.msk.f32.mxu0 %vm5776_vm1, %v5775_v2 }
 0x85b   :  { %v3718_v20 = vpop.trf.xlu1  ;;  %5516 = vmatprep.mubr.msk.f32.mxu1 %vm5776_vm1, %v5775_v2  ;;  %5524 = vmatprep.subr.mxu1 %v5775_v2 }
 0x85c   :  { %v3613_v21 = vpop.trf.xlu0  ;;  %5517 = vmatmul.mubr.msk.f32.vlgmr.msra.gmra.mrb[48].mxu1 %vm543_vm2, %v3718_v20  ;;  %5519 = vmatprep.subr.mxu0 %v5775_v2 }
 0x85d   :  { %5512 = vmatmul.mubr.msk.f32.vlgmr.msra.gmra.mrb[48].mxu0 %vm543_vm2, %v3613_v21  ;;  %5526 = vmatprep.mubr.msk.f32.mxu1 %vm5776_vm1, %v5775_v2 }
 0x85e   :  { %5521 = vmatprep.mubr.msk.f32.mxu0 %vm5776_vm1, %v5775_v2 }
 0x91f   :  { %v3173_v22 = vpop.f32.mrb[42].mxu1 }
 0x920   :  { %v3068_v23 = vpop.f32.mrb[42].mxu0  ;;  %v5488_v24 = vpop.f32.mrb[43].mxu1  ;;  %v3811_v26 = vsel %vm3807_vm4, %v3173_v22, -inf }
 0x921   :  { %3812 = vmax.xlane.f32.xlu1 %v3811_v26  ;;  %v3808_v27 = vsel %vm3807_vm4, %v3068_v23, -inf  ;;  %v5483_v28 = vpop.f32.mrb[43].mxu0 }
 0x922   :  { %3809 = vmax.xlane.f32.xlu0 %v3808_v27 }
 0x923   :  { %v3383_v29 = vpop.f32.mrb[44].mxu1 }
 0x924   :  { %v5498_v30 = vpop.f32.mrb[45].mxu1  ;;  %v3817_v32 = vsel %vm3807_vm4, %v3383_v29, -inf }
 0x925   :  { %3818 = vmax.xlane.f32.xlu1 %v3817_v32 }
 0x927   :  { %v3278_v33 = vpop.f32.mrb[44].mxu0 }
 0x928   :  { %v5493_v38 = vpop.f32.mrb[45].mxu0  ;;  %v3814_v1 = vsel %vm3807_vm4, %v3278_v33, -inf }
 0x929   :  { %3815 = vmax.xlane.f32.xlu1 %v3814_v1 }
 0x92b   :  { %v3593_v41 = vpop.f32.mrb[46].mxu1 }
 0x92c   :  { %v3488_v42 = vpop.f32.mrb[46].mxu0  ;;  %v3823_v44 = vsel %vm3807_vm4, %v3593_v41, -inf  ;;  %v5508_v6 = vpop.f32.mrb[47].mxu1 }
 0x92d   :  { %v5503_v45 = vpop.f32.mrb[47].mxu0  ;;  %3824 = vmax.xlane.f32.xlu1 %v3823_v44  ;;  %v3820_v46 = vsel %vm3807_vm4, %v3488_v42, -inf }
 0x92e   :  { %3821 = vmax.xlane.f32.xlu0 %v3820_v46 }
 0x92f   :  { %v3803_v55 = vpop.f32.mrb[48].mxu1 }
 0x930   :  { %v3698_v56 = vpop.f32.mrb[48].mxu0  ;;  %v3829_v57 = vsel %vm3807_vm4, %v3803_v55, -inf  ;;  %v5518_v58 = vpop.f32.mrb[49].mxu1 }
 0x931   :  { %3830 = vmax.xlane.f32.xlu1 %v3829_v57  ;;  %v3826_v50 = vsel %vm3807_vm4, %v3698_v56, -inf  ;;  %v5513_v59 = vpop.f32.mrb[49].mxu0  ;;  %v5063_v57 = vld [vmem:[%s6648_s3 + $0xb0] sm:$0xff]  ;;  %v5064_v58 = vld [vmem:[%s6648_s3 + $0xb8] sm:$0xff] }
 0x932   :  { %3827 = vmax.xlane.f32.xlu0 %v3826_v50 }
 0x942   :  { %2684 = vperm.xlu1 %5663, %v5062_v60  }
 0x948   :  { %2679 = vperm.xlu0 %5662, %v5061_v61  }
 0x9ae   :  { %v3813_v62 = vpop.xlane.xlu1 %3812 }
 0x9af   :  { %v3833_v35 = vsub.f32 %v3173_v22, %v3813_v62  ;;  %v3810_v49 = vpop.xlane.xlu0 %3809 }
 0x9b0   :  { %v3832_v63 = vsub.f32 %v3068_v23, %v3810_v49 }
 0x9b1   :  { %v3842_v7 = vmul.f32 1.442695, %v3833_v35 }
 0x9b2   :  { %v3840_v8 = vmul.f32 1.442695, %v3832_v63  ;;  %v3819_v10 = vpop.xlane.xlu1 %3818 }
 0x9b3   :  { %5712 = vpow2.f32 %v3842_v7  ;;  %v3835_v51 = vsub.f32 %v3383_v29, %v3819_v10 }
 0x9b4   :  { %5714 = vpow2.f32 %v3840_v8 }
 0x9b5   :  { %v3846_v36 = vmul.f32 1.442695, %v3835_v51 }
 0x9b6   :  { %v3816_v43 = vpop.xlane.xlu1 %3815 }
 0x9b7   :  { %5716 = vpow2.f32 %v3846_v36  ;;  %v3834_v12 = vsub.f32 %v3278_v33, %v3816_v43 }
 0x9b9   :  { %v3844_v13 = vmul.f32 1.442695, %v3834_v12 }
 0x9ba   :  { %v3825_v14 = vpop.xlane.xlu1 %3824 }
 0x9bb   :  { %5718 = vpow2.f32 %v3844_v13  ;;  %v3837_v15 = vsub.f32 %v3593_v41, %v3825_v14  ;;  %v3822_v16 = vpop.xlane.xlu0 %3821 }
 0x9bc   :  { %v3836_v17 = vsub.f32 %v3488_v42, %v3822_v16 }
 0x9bd   :  { %v5713_v18 = vpop.eup %5712  ;;  %v3850_v19 = vmul.f32 1.442695, %v3837_v15 }
 0x9be   :  { %v5715_v20 = vpop.eup %5714  ;;  %v3848_v21 = vmul.f32 1.442695, %v3836_v17  ;;  %v3831_v22 = vpop.xlane.xlu1 %3830  ;;  %v3859_v23 = vsel %vm3807_vm4, %v5713_v18, 0.0 }
 0x9bf   :  { %5720 = vpow2.f32 %v3850_v19  ;;  %v3839_v24 = vsub.f32 %v3803_v55, %v3831_v22  ;;  %v3828_v26 = vpop.xlane.xlu0 %3827  ;;  %3860 = vadd.xlane.f32.xlu1 %v3859_v23  ;;  %v3856_v27 = vsel %vm3807_vm4, %v5715_v20, 0.0 }
 0x9c0   :  { %5722 = vpow2.f32 %v3848_v21  ;;  %v3838_v28 = vsub.f32 %v3698_v56, %v3828_v26  ;;  %3857 = vadd.xlane.f32.xlu0 %v3856_v27 }
 0x9c1   :  { %v5717_v29 = vpop.eup %5716  ;;  %v3854_v30 = vmul.f32 1.442695, %v3839_v24 }
 0x9c2   :  { %v3852_v32 = vmul.f32 1.442695, %v3838_v28  ;;  %v3865_v33 = vsel %vm3807_vm4, %v5717_v29, 0.0  ;;  %v2685_v50 = vpop.permute.xlu1 %2684 }
 0x9c3   :  { %5724 = vpow2.f32 %v3854_v30  ;;  %3866 = vadd.xlane.f32.xlu1 %v3865_v33  ;;  %v2819_v43 = vadd.f32 %v6405_v5, %v2685_v50 }
 0x9c4   :  { %5726 = vpow2.f32 %v3852_v32  ;;  %v5068_v32 = vld [vmem:[%s6649_s4 + $0x58] sm:$0xff] }
 0x9c5   :  { %v5719_v38 = vpop.eup %5718 }
 0x9c6   :  { %v3862_v1 = vsel %vm3807_vm4, %v5719_v38, 0.0 }
 0x9c7   :  { %3863 = vadd.xlane.f32.xlu0 %v3862_v1  ;;  %v2680_v59 = vpop.permute.xlu0 %2679 }
 0x9c8   :  { %v2814_v12 = vadd.f32 %v6409_v0, %v2680_v59  ;;  %v2949_v27 = vadd.f32 %v6407_v53, %v2680_v59 }
 0x9c9   :  { %v5721_v41 = vpop.eup %5720 }
 0x9ca   :  { %v5723_v42 = vpop.eup %5722  ;;  %v3871_v44 = vsel %vm3807_vm4, %v5721_v41, 0.0 }
 0x9cb   :  { %3872 = vadd.xlane.f32.xlu1 %v3871_v44  ;;  %v3868_v6 = vsel %vm3807_vm4, %v5723_v42, 0.0  ;;  %v5070_v44 = vld [vmem:[%s6649_s4 + $0x68] sm:$0xff] }
 0x9cc   :  { %3869 = vadd.xlane.f32.xlu0 %v3868_v6  ;;  %v5071_v6 = vld [vmem:[%s6649_s4 + $0x70] sm:$0xff] }
 0x9cd   :  { %v6469_v45 = vpop.eup %5724 }
 0x9ce   :  { %v6471_v46 = vpop.eup %5726  ;;  %v3877_v55 = vsel %vm3807_vm4, %v6469_v45, 0.0 }
 0x9cf   :  { %3878 = vadd.xlane.f32.xlu1 %v3877_v55  ;;  %v3874_v56 = vsel %vm3807_vm4, %v6471_v46, 0.0 }
 0x9d0   :  { %3875 = vadd.xlane.f32.xlu0 %v3874_v56 }
 0x9e0   :  { %2689 = vperm.xlu1 %5663, %v5063_v57  }
 0x9e6   :  { %2694 = vperm.xlu0 %5662, %v5064_v58  }
 0xa4c   :  { %v3861_v60 = vpop.xlane.xlu1 %3860 }
 0xa4d   :  { %5728 = vrcp.f32 %v3861_v60  ;;  %v3858_v61 = vpop.xlane.xlu0 %3857 }
 0xa4e   :  { %5730 = vrcp.f32 %v3858_v61 }
 0xa50   :  { %v3867_v62 = vpop.xlane.xlu1 %3866 }
 0xa51   :  { %5732 = vrcp.f32 %v3867_v62 }
 0xa54   :  { %v3864_v35 = vpop.xlane.xlu0 %3863 }
 0xa55   :  { %5734 = vrcp.f32 %v3864_v35 }
 0xa57   :  { %v5729_v49 = vpop.eup %5728 }
 0xa58   :  { %v5731_v63 = vpop.eup %5730  ;;  %v3889_v7 = vmul.f32 %v5729_v49, %v5713_v18  ;;  %v3873_v8 = vpop.xlane.xlu1 %3872 }
 0xa59   :  { %v3888_v10 = vmul.f32 %v5731_v63, %v5715_v20  ;;  %5736 = vrcp.f32 %v3873_v8  ;;  %v3870_v51 = vpop.xlane.xlu0 %3869 }
 0xa5a   :  { %5738 = vrcp.f32 %v3870_v51  ;;  %5525 = vmatpush3.xpose.msk.msra.mxu1 %vm3807_vm4, %v3889_v7 }
 0xa5b   :  { %v5733_v36 = vpop.eup %5732  ;;  %5520 = vmatpush3.xpose.msk.msra.mxu0 %vm3807_vm4, %v3888_v10  ;;  %5534 = vmatprep.subr.mxu1 %v5775_v2  ;;  %v6564_v10 = vld [vmem:[%s6651_s6 + $0x8] sm:$0x7f] }
 0xa5c   :  { %v3891_v13 = vmul.f32 %v5733_v36, %v5717_v29  ;;  %v3879_v14 = vpop.xlane.xlu1 %3878  ;;  %5529 = vmatprep.subr.mxu0 %v5775_v2  ;;  %v5067_v29 = vld [vmem:[%s6649_s4 + $0x50] sm:$0xff]  ;;  %v4717_v51 = vrot.slane %v6564_v10, %v2376_v25  ;;  %v4723_v36 = vrot.slane %v6564_v10, %v75_v37 }
 0xa5d   :  { %5740 = vrcp.f32 %v3879_v14  ;;  %v3876_v15 = vpop.xlane.xlu0 %3875  ;;  %5527 = vmatmul.mubr.msk.f32.vlgmr.msra.gmra.mrb[50].mxu1 %vm3807_vm4, %v2819_v43  ;;  %v5631_v33 = vpack.c.bf16 %v5068_v32, %v5067_v29 }
 0xa5e   :  { %5742 = vrcp.f32 %v3876_v15  ;;  %5522 = vmatmul.mubr.msk.f32.vlgmr.msra.gmra.mrb[50].mxu0 %vm3807_vm4, %v2814_v12  ;;  %5535 = vmatpush3.xpose.msk.msra.mxu1 %vm3807_vm4, %v3891_v13 }
 0xa5f   :  { %v5735_v5 = vpop.eup %5734  ;;  %5531 = vmatprep.mubr.msk.f32.mxu0 %vm5776_vm1, %v5775_v2  ;;  %5536 = vmatprep.mubr.msk.f32.mxu1 %vm5776_vm1, %v5775_v2 }
 0xa60   :  { %v3890_v0 = vmul.f32 %v5735_v5, %v5719_v38  ;;  %v2690_v16 = vpop.permute.xlu1 %2689  ;;  %5544 = vmatprep.subr.mxu1 %v5775_v2 }
 0xa61   :  { %v2824_v18 = vadd.f32 %v6417_v47, %v2690_v16  ;;  %v2959_v53 = vadd.f32 %v6415_v52, %v2690_v16  ;;  %v5065_v52 = vld [vmem:[%s6649_s4 + $0x40] sm:$0xff] }
 0xa62   :  { %5530 = vmatpush3.xpose.msk.msra.mxu0 %vm3807_vm4, %v3890_v0 }
 0xa63   :  { %v5737_v17 = vpop.eup %5736  ;;  %5539 = vmatprep.subr.mxu0 %v5775_v2 }
 0xa64   :  { %v5739_v19 = vpop.eup %5738  ;;  %v3893_v20 = vmul.f32 %v5737_v17, %v5721_v41 }
 0xa65   :  { %v3892_v21 = vmul.f32 %v5739_v19, %v5723_v42  ;;  %v2695_v22 = vpop.permute.xlu0 %2694  ;;  %5532 = vmatmul.mubr.msk.f32.vlgmr.msra.gmra.mrb[52].mxu0 %vm3807_vm4, %v2824_v18  ;;  %v5069_v42 = vld [vmem:[%s6649_s4 + $0x60] sm:$0xff] }
 0xa66   :  { %v2829_v23 = vadd.f32 %v6413_v9, %v2695_v22  ;;  %5541 = vmatprep.mubr.msk.f32.mxu0 %vm5776_vm1, %v5775_v2  ;;  %v2954_v9 = vadd.f32 %v6403_v4, %v2685_v50  ;;  %v2964_v4 = vadd.f32 %v6411_v54, %v2695_v22  ;;  %v5066_v54 = vld [vmem:[%s6649_s4 + $0x48] sm:$0xff]  ;;  %v4770_v22 = vld [vmem:[%s6650_s5] sm:$0xff] }
 0xa67   :  { %v5741_v24 = vpop.eup %5740  ;;  %5540 = vmatpush3.xpose.msk.msra.mxu0 %vm3807_vm4, %v3892_v21  ;;  %v5628_v30 = vpack.c.bf16 %v5066_v54, %v5065_v52 }
 0xa68   :  { %v5743_v26 = vpop.eup %5742  ;;  %5537 = vmatmul.mubr.msk.f32.vlgmr.msra.gmra.mrb[52].mxu1 %vm3807_vm4, %v2829_v23  ;;  %5549 = vmatprep.subr.mxu0 %v5775_v2  ;;  %v3895_v47 = vmul.f32 %v5741_v24, %v6469_v45  ;;  %v5634_v45 = vpack.c.bf16 %v5070_v44, %v5069_v42  ;;  %v4771_v23 = vld [vmem:[%s6650_s5 + $0x8] sm:$0xff]  ;;  %v4772_v24 = vld [vmem:[%s6650_s5 + $0x10] sm:$0xff]  ;;  %v4766_v44 = vsub.s32 7, %v5873_v34 }
 0xa69   :  { %v3894_v28 = vmul.f32 %v5743_v26, %v6471_v46  ;;  %5545 = vmatpush3.xpose.msk.msra.mxu1 %vm3807_vm4, %v3893_v20  ;;  %5546 = vmatprep.mubr.msk.f32.mxu1 %vm5776_vm1, %v5775_v2  ;;  %v5072_v46 = vld [vmem:[%s6649_s4 + $0x78] sm:$0xff] }
 0xa6a   :  { %5542 = vmatmul.mubr.msk.f32.vlgmr.msra.gmra.mrb[54].mxu0 %vm3807_vm4, %v2949_v27  ;;  %5554 = vmatprep.subr.mxu1 %v5775_v2  ;;  %v5637_v55 = vpack.c.bf16 %v5072_v46, %v5071_v6  ;;  %v4773_v26 = vld [vmem:[%s6650_s5 + $0x18] sm:$0xff] }
 0xa6b   :  { %5550 = vmatpush3.xpose.msk.msra.mxu0 %vm3807_vm4, %v3894_v28  ;;  %5551 = vmatprep.mubr.msk.f32.mxu0 %vm5776_vm1, %v5775_v2  ;;  %v5643_v27 = vpack.c.bf16 %v4773_v26, %v4772_v24  ;;  %v5132_v28 = vld [vmem:[%s6650_s5 + $0x28] sm:$0xff] }
 0xa6c   :  { %5547 = vmatmul.mubr.msk.f32.vlgmr.msra.gmra.mrb[54].mxu1 %vm3807_vm4, %v2954_v9  ;;  %5627 = vmatprep.subr.bf16.mxu0 %v5777_v11 }
 0xa6d   :  { %5555 = vmatpush3.xpose.msk.msra.mxu1 %vm3807_vm4, %v3895_v47  ;;  %5556 = vmatprep.mubr.msk.f32.mxu1 %vm5776_vm1, %v5775_v2  ;;  %v5131_v47 = vld [vmem:[%s6650_s5 + $0x20] sm:$0xff] }
 0xa6e   :  { %5552 = vmatmul.mubr.msk.f32.vlgmr.msra.gmra.mrb[56].mxu0 %vm3807_vm4, %v2959_v53  ;;  %5633 = vmatprep.subr.bf16.mxu1 %v5777_v11  ;;  %v5647_v9 = vpack.c.bf16 %v5132_v28, %v5131_v47 }
 0xa6f   :  { %5567 = vmatprep.mubr.msk.f32.mxu0 %vm5776_vm1, %v5775_v2  ;;  %5629 = vmatpush3.bf16.msra.mxu0 %v5628_v30 }
 0xa70   :  { %5557 = vmatmul.mubr.msk.f32.vlgmr.msra.gmra.mrb[56].mxu1 %vm3807_vm4, %v2964_v4  ;;  %5630 = vmatprep.subr.bf16.mxu0 %v5777_v11 }
 0xa71   :  { %5578 = vmatprep.mubr.msk.f32.mxu1 %vm5776_vm1, %v5775_v2  ;;  %5635 = vmatpush3.bf16.msra.mxu1 %v5634_v45 }
 0xa72   :  { %5636 = vmatprep.subr.bf16.mxu1 %v5777_v11 }
 0xa73   :  { %5632 = vmatpush3.bf16.msra.mxu0 %v5631_v33 }
 0xa75   :  { %5638 = vmatpush3.bf16.msra.mxu1 %v5637_v55 }
 0xa76   :  { %5648 = vmatprep.subr.bf16.mxu1 %v5647_v9 }
 0xb30   :  { %v4044_v2 = vpop.f32.mrb[50].mxu1 }
 0xb31   :  { %v3968_v38 = vpop.f32.mrb[50].mxu0  ;;  %v5528_v1 = vpop.f32.mrb[51].mxu1 }
 0xb32   :  { %4504 = vxpose.xlu1.b32.start [1/4] (short) (narrow) %v3968_v38, 8  ;;  %v5523_v41 = vpop.f32.mrb[51].mxu0  ;;  %v4760_v1 = vsub.s32 6, %v5873_v34 }
 0xb34   :  { %v4761_v46 = vrot.slane %v6296_v39, %v4760_v1 }
 0xb36   :  { %4505 = vxpose.xlu1.b32.cont [2/4] (short) (narrow) %v4044_v2, 8 }
 0xb38   :  { %v4120_v56 = vpop.f32.mrb[52].mxu0 }
 0xb39   :  { %v5533_v57 = vpop.f32.mrb[53].mxu0 }
 0xb3a   :  { %4506 = vxpose.xlu1.b32.cont [3/4] (short) (narrow) %v4120_v56, 8 }
 0xb3b   :  { %v4196_v58 = vpop.f32.mrb[52].mxu1 }
 0xb3c   :  { %v5538_v50 = vpop.f32.mrb[53].mxu1 }
 0xb3d   :  { %v4272_v59 = vpop.f32.mrb[54].mxu0 }
 0xb3e   :  { %4609 = vxpose.xlu0.b32.start [1/4] (short) (narrow) %v4272_v59, 8  ;;  %v5543_v60 = vpop.f32.mrb[55].mxu0  ;;  %4507 = vxpose.xlu1.b32.end [4/4] (short) (narrow) %v4196_v58, 8  ;;  %v4767_v58 = vrot.slane %v6296_v39, %v4766_v44  ;;  %v5134_v39 = vld [vmem:[%s6650_s5 + $0x38] sm:$0xff] }
 0xb3f   :  { %v4348_v61 = vpop.f32.mrb[54].mxu1 }
 0xb40   :  { %v5548_v62 = vpop.f32.mrb[55].mxu1 }
 0xb41   :  { %v4424_v35 = vpop.f32.mrb[56].mxu0 }
 0xb42   :  { %v5553_v49 = vpop.f32.mrb[57].mxu0  ;;  %4610 = vxpose.xlu0.b32.cont [2/4] (short) (narrow) %v4348_v61, 8 }
 0xb43   :  { %v4500_v63 = vpop.f32.mrb[56].mxu1 }
 0xb44   :  { %v5558_v7 = vpop.f32.mrb[57].mxu1 }
 0xb46   :  { %4611 = vxpose.xlu0.b32.cont [3/4] (short) (narrow) %v4424_v35, 8 }
 0xb4a   :  { %4612 = vxpose.xlu0.b32.end [4/4] (short) (narrow) %v4500_v63, 8  ;;  %v5133_v63 = vld [vmem:[%s6650_s5 + $0x30] sm:$0xff]  ;;  %s5778_s5 = smov [#allocation2]  }
 0xb4b   :  { %v5651_v7 = vpack.c.bf16 %v5134_v39, %v5133_v63  ;;  %s4966_s9 = sshll.u32 %s5778_s5, 4  ;;  %s4967_s9 = int_to_ptr.vmem [resolvable:$true] %s4966_s9 }
 0xb4c   :  { %s5750_s10 = scalar_lea.vmem %s4967_s9, 256  ;;  %p5755_p1 = scmp.lt.s32.totalorder %s4967_s9, %s4967_s9 }
 0xb4d   :  { %p5751_p0 = scmp.ne.s32.totalorder %s4967_s9, %s5750_s10  ;;  %p5756_p2 = scmp.lt.s32.totalorder %s5750_s10, %s5750_s10 }
 0xb4f   :  { %p5757_p3 = por %p5756_p2, %p5755_p1 }
 0xb51   :  { %p5758_p4 = pnand %p5757_p3, %p5751_p0 }
 0xbb2   :  { %v4520_v11 = vpop.trf.xlu1 }
 0xbb3   :  { %5568 = vmatmul.mubr.msk.f32.vlgmr.msra.gmra.mrb[58].mxu0 %vm35_vm0, %v4520_v11  ;;  %v4777_v11 = vrot.slane %v6564_v10, %v2384_v31 }
 0xbbe   :  { %v4625_v8 = vpop.trf.xlu0 }
 0xbbf   :  { %5579 = vmatmul.mubr.msk.f32.vlgmr.msra.gmra.mrb[58].mxu1 %vm35_vm0, %v4625_v8 }
 0xbc0   :  { %5650 = vmatpush3.bf16.msra.mxu1 %v5647_v9 }
 0xbc1   :  { %5652 = vmatprep.subr.bf16.mxu1 %v5651_v7 }
 0xbc4   :  { %5654 = vmatpush3.bf16.msra.mxu1 %v5651_v7 }
 0xc86   :  { %v4605_v43 = vpop.f32.mrb[58].mxu0 }
 0xc87   :  { %v4718_v12 = vadd.f32 %v4717_v51, %v4605_v43  ;;  %v5569_v13 = vpop.f32.mrb[59].mxu0 }
 0xc89   :  { %v4724_v14 = vmul.f32 %v4723_v36, %v4718_v12 }
 0xc8b   :  { %v6573_v15 = vadd.f32 %v4724_v14, %v6161_v48  ;;  %v4869_v14 = vrot.slane %v6564_v10, %v4760_v1 }
 0xc8d   :  { %v4728_v5 = vsel %vm35_vm0, %v6573_v15, 0.0  ;;  %v4736_v0 = vmul.f32 %v6573_v15, %v6573_v15 }
 0xc8e   :  { %4729 = vadd.xlane.f32.xlu0 %v4728_v5  ;;  %v4954_v5 = vrot.slane %v6564_v10, %v2304_v40 }
 0xc8f   :  { %v4738_v25 = vsel %vm35_vm0, %v4736_v0, 0.0 }
 0xc92   :  { %v4710_v16 = vpop.f32.mrb[58].mxu1  ;;  %4739 = vadd.xlane.f32.xlu0 %v4738_v25 }
 0xc93   :  { %v4719_v17 = vadd.f32 %v4717_v51, %v4710_v16  ;;  %v5580_v37 = vpop.f32.mrb[59].mxu1 }
 0xc95   :  { %v4725_v18 = vmul.f32 %v4723_v36, %v4719_v17 }
 0xc97   :  { %v6581_v19 = vadd.f32 %v4725_v18, %v6169_v3  ;;  %v5639_v3 = vpack.c.bf16 %v4771_v23, %v4770_v22 }
 0xc99   :  { %v4731_v48 = vsel %vm35_vm0, %v6581_v19, 0.0  ;;  %v4737_v20 = vmul.f32 %v6581_v19, %v6581_v19  ;;  %5640 = vmatprep.subr.bf16.mxu0 %v5639_v3 }
 0xc9a   :  { %4732 = vadd.xlane.f32.xlu1 %v4731_v48  ;;  %5642 = vmatpush3.bf16.msra.mxu0 %v5639_v3 }
 0xc9b   :  { %v4741_v21 = vsel %vm35_vm0, %v4737_v20, 0.0  ;;  %5644 = vmatprep.subr.bf16.mxu0 %v5643_v27 }
 0xc9e   :  { %4742 = vadd.xlane.f32.xlu1 %v4741_v21  ;;  %5646 = vmatpush3.bf16.msra.mxu0 %v5643_v27 }
 0xd1b   :  { %v4730_v53 = vpop.xlane.xlu0 %4729 }
 0xd1c   :  { %v4734_v4 = vmul.f32 0.03125, %v4730_v53 }
 0xd1e   :  { %v4746_v54 = vmul.f32 %v4734_v4, %v4734_v4  ;;  %v4754_v45 = vsub.f32 %v6573_v15, %v4734_v4 }
 0xd1f   :  { %v4740_v52 = vpop.xlane.xlu0 %4739 }
 0xd20   :  { %v4744_v29 = vmul.f32 0.03125, %v4740_v52 }
 0xd22   :  { %v4748_v30 = vsub.f32 %v4744_v29, %v4746_v54 }
 0xd24   :  { %v4750_v32 = vadd.f32 1e-05, %v4748_v30 }
 0xd26   :  { %5744 = vrsqrt.f32 %v4750_v32 }
 0xd27   :  { %v4733_v33 = vpop.xlane.xlu1 %4732 }
 0xd28   :  { %v4735_v2 = vmul.f32 0.03125, %v4733_v33 }
 0xd2a   :  { %v4747_v41 = vmul.f32 %v4735_v2, %v4735_v2  ;;  %v4755_v60 = vsub.f32 %v6581_v19, %v4735_v2 }
 0xd2b   :  { %v4743_v38 = vpop.xlane.xlu1 %4742 }
 0xd2c   :  { %v4745_v42 = vmul.f32 0.03125, %v4743_v38 }
 0xd2e   :  { %v4749_v6 = vsub.f32 %v4745_v42, %v4747_v41 }
 0xd30   :  { %v5745_v55 = vpop.eup %5744  ;;  %v4751_v56 = vadd.f32 1e-05, %v4749_v6 }
 0xd31   :  { %v4756_v57 = vmul.f32 %v5745_v55, %v4754_v45 }
 0xd32   :  { %5746 = vrsqrt.f32 %v4751_v56 }
 0xd33   :  { %v4762_v50 = vmul.f32 %v4761_v46, %v4756_v57 }
 0xd35   :  { %v4768_v59 = vadd.f32 %v4767_v58, %v4762_v50 }
 0xd37   :  { %5589 = vmatprep.mubr.msk.f32.mxu0 %vm35_vm0, %v4768_v59 }
 0xd3c   :  { %v5747_v61 = vpop.eup %5746 }
 0xd3d   :  { %v4757_v62 = vmul.f32 %v5747_v61, %v4755_v60 }
 0xd3f   :  { %v4763_v35 = vmul.f32 %v4761_v46, %v4757_v62 }
 0xd41   :  { %v4769_v49 = vadd.f32 %v4767_v58, %v4763_v35 }
 0xd43   :  { %5590 = vmatmul.mubr.msk.f32.vlgmr.msra.gmra.mrb[60].mxu0 %vm35_vm0, %v4769_v49 }
 0xe16   :  { %v5591_v8 = vpop.f32.mrb[60].mxu0 }
 0xe17   :  { %v4856_v51 = vadd.f32 %v5591_v8, %v4777_v11  ;;  %v4850_v36 = vpop.f32.mrb[61].mxu0 }
 0xe18   :  { %v4851_v43 = vadd.f32 %v4850_v36, %v4777_v11 }
 0xe19   :  { %v4860_v13 = vmax.f32 %v4856_v51, 0.0 }
 0xe1a   :  { %v4859_v12 = vmax.f32 %v4851_v43, 0.0 }
 0xe1c   :  { %5600 = vmatprep.mubr.msk.f32.mxu1 %vm35_vm0, %v4859_v12 }
 0xe1d   :  { %5601 = vmatmul.mubr.msk.f32.vlgmr.msra.gmra.mrb[60].mxu1 %vm35_vm0, %v4860_v13 }
 0xef0   :  { %v5602_v0 = vpop.f32.mrb[60].mxu1 }
 0xef1   :  { %v4948_v25 = vadd.f32 %v5602_v0, %v4869_v14  ;;  %v4942_v16 = vpop.f32.mrb[61].mxu1 }
 0xef2   :  { %v4943_v31 = vadd.f32 %v4942_v16, %v4869_v14 }
 0xef3   :  { %v4956_v17 = vmul.f32 %v4954_v5, %v4948_v25 }
 0xef4   :  { %v4955_v37 = vmul.f32 %v4954_v5, %v4943_v31 }
 0xef5   :  { %v4958_v18 = vadd.f32 %v4956_v17, %v6581_v19 }
 0xef6   :  { %v4957_v48 = vadd.f32 %v4955_v37, %v6573_v15 }
 0xef7   :  { %4960 = vst.msk [vmem:[#allocation2 + $0x8] sm:$0xff] %vm35_vm0, %v4958_v18 }
 0xef8   :  { %4959 = vst.msk [vmem:[#allocation2] sm:$0xff] %vm35_vm0, %v4957_v48 }
 0xef9   :  { %5761 = shalt.err (!%p5758_p4)
}
 0xefa   :  { %s5762_s13 = scalar_lea.hbm %s6652_s7, 256 }
 0xefb   :  { %p5763_p5 = scmp.ne.s32.totalorder %s6652_s7, %s5762_s13  ;;  %p5766_p6 = scmp.lt.u32.totalorder %s5762_s13, %s6652_s7 }
 0xefd   :  { %p5768_p7 = pnand %p5766_p6, %p5763_p5 }
 0xeff   :  { %5771 = shalt.err (!%p5768_p7)
}
 0xf00   :  { %s5779_s18 = smov 128   ;;  %s5780_s19 = smov 8  }
 0xf01   :  { %4972 = dma.vmem_to_hbm [thread:$0]  %s4967_s9, 256, %s6652_s7, [#allocation3], %s5779_s18, %s5779_s18, %s5780_s19  }
 0xf02   :  { %5772 = dma.done.wait [#allocation3], 256  }
 0xf03   :  { %5773 = vsyncadd [#allocation3], 4294967040 }
 0xf04   :  { %4976 = vsyncpa [#allocation3], 1 }

</bundles_post_ra>
